<compile_context>
chip_gen: v6e
topology: v6e:2x2x1
jax: 0.10.0
libtpu: 0.0.40
codegen_flags: <defaults>
</compile_context>

<pallas_src>
from functools import partial

import numpy as np

import jax
import jax.numpy as jnp
from jax import lax
from jax.experimental import pallas as pl
from jax.experimental.pallas import tpu as pltpu


# ----------------------------------------------------------------------------
# Fused Pallas kernel (one batch element per grid step)
# ----------------------------------------------------------------------------

def _bottleneck_kernel(x_ref, w1t_ref, s1_ref, b1_ref,
                       w2t_ref, s2_ref, b2_ref,
                       w3t_ref, s3_ref, b3_ref, mask_ref,
                       o_ref, ypad_ref, patch_ref,
                       *, D, H, W, planes, pg, pad):
    M = D * H * W

    x = x_ref[0].astype(jnp.float32)                          # (Cin, M)

    # --- conv1: 1x1x1 conv + folded BN + ReLU (transposed: M on lane axis) ---
    y1 = jnp.dot(w1t_ref[...], x, preferred_element_type=jnp.float32)
    y1 = jnp.maximum(y1 * s1_ref[...] + b1_ref[...], 0.0)     # (planes, M)

    # --- conv2: 3x3x3 conv (stride 1, zero pad 1) + BN + ReLU --------------
    # Zero-padded flat buffer: ypad[:, pad:pad+M] = y1, zeros elsewhere so the
    # statically-shifted tap slices never read garbage.
    ypad_ref[...] = jnp.zeros_like(ypad_ref)
    ypad_ref[:, pad:pad + M] = y1

    # im2col: pack each masked shifted slab into an 8-sublane-aligned group of
    # the patch matrix (rows pg*k .. pg*k+planes); unused rows stay zero and
    # line up with zero columns of the flattened weight.
    patch_ref[...] = jnp.zeros_like(patch_ref)
    k = 0
    for dd in (-1, 0, 1):
        for dh in (-1, 0, 1):
            for dw in (-1, 0, 1):
                s = dd * H * W + dh * W + dw                  # flat tap shift
                shifted = ypad_ref[:, pad + s: pad + s + M]   # (planes, M)
                shifted = shifted * mask_ref[k:k + 1, :]      # zero-pad bounds
                patch_ref[pg * k: pg * k + planes, :] = shifted
                k += 1

    # Single lane-dense MXU matmul: (planes, 27*pg) @ (27*pg, M).
    y2 = jnp.dot(w2t_ref[...], patch_ref[...],
                 preferred_element_type=jnp.float32)
    y2 = jnp.maximum(y2 * s2_ref[...] + b2_ref[...], 0.0)     # (planes, M)

    # --- conv3: 1x1x1 conv + BN, residual add (identity), ReLU -------------
    y3 = jnp.dot(w3t_ref[...], y2, preferred_element_type=jnp.float32)
    y3 = y3 * s3_ref[...] + b3_ref[...] + x                   # Cin == Cout
    o_ref[0] = jnp.maximum(y3, 0.0).astype(o_ref.dtype)


# ----------------------------------------------------------------------------
# Wrapper
# ----------------------------------------------------------------------------

def _make_tap_masks(D, H, W):
    """(27, D*H*W) float32 masks: 1 where tap (dd,dh,dw) stays in bounds."""
    M = D * H * W
    p = np.arange(M)
    d, h, w = p // (H * W), (p // W) % H, p % W
    masks = np.zeros((27, M), np.float32)
    k = 0
    for dd in (-1, 0, 1):
        for dh in (-1, 0, 1):
            for dw in (-1, 0, 1):
                valid = ((d + dd >= 0) & (d + dd < D) &
                         (h + dh >= 0) & (h + dh < H) &
                         (w + dw >= 0) & (w + dw < W))
                masks[k] = valid.astype(np.float32)
                k += 1
    return jnp.asarray(masks)


@jax.jit
def bottleneck_forward(x_ncdhw, params):
    (w1, s1, b1, w2, s2, b2, w3, s3, b3) = params
    N, Cin, D, H, W = x_ncdhw.shape
    planes = w1.shape[1]
    Cout = w3.shape[1]
    assert Cin == Cout, "identity residual requires inplanes == planes*expansion"
    M = D * H * W
    pg = ((planes + 7) // 8) * 8                    # sublane-aligned tap group
    pad = ((H * W + W + 1 + 127) // 128) * 128      # >= max |tap shift|

    # NCDHW -> (N, C, D*H*W): contiguous trailing-dim merge, no data movement.
    x3 = x_ncdhw.reshape(N, Cin, M)

    # Pre-flattened / transposed weights for the (C, M) compute layout.
    w1t = w1.T                                                    # (planes, Cin)
    w2r = w2.reshape(27, planes, planes)
    w2t = jnp.pad(w2r, ((0, 0), (0, pg - planes), (0, 0))
                  ).reshape(27 * pg, planes).T                    # (planes, 27*pg)
    w3t = w3.T                                                    # (Cout, planes)
    masks = _make_tap_masks(D, H, W)                              # (27, M)

    kern = partial(_bottleneck_kernel, D=D, H=H, W=W,
                   planes=planes, pg=pg, pad=pad)

    out3 = pl.pallas_call(
        kern,
        out_shape=jax.ShapeDtypeStruct((N, Cout, M), x_ncdhw.dtype),
        grid=(N,),
        in_specs=[
            pl.BlockSpec((1, Cin, M), lambda n: (n, 0, 0)),
            pl.BlockSpec((planes, Cin), lambda n: (0, 0)),
            pl.BlockSpec((planes, 1), lambda n: (0, 0)),
            pl.BlockSpec((planes, 1), lambda n: (0, 0)),
            pl.BlockSpec((planes, 27 * pg), lambda n: (0, 0)),
            pl.BlockSpec((planes, 1), lambda n: (0, 0)),
            pl.BlockSpec((planes, 1), lambda n: (0, 0)),
            pl.BlockSpec((Cout, planes), lambda n: (0, 0)),
            pl.BlockSpec((Cout, 1), lambda n: (0, 0)),
            pl.BlockSpec((Cout, 1), lambda n: (0, 0)),
            pl.BlockSpec((27, M), lambda n: (0, 0)),
        ],
        out_specs=pl.BlockSpec((1, Cout, M), lambda n: (n, 0, 0)),
        scratch_shapes=[
            pltpu.VMEM((planes, M + 2 * pad), jnp.float32),   # padded y1 slab
            pltpu.VMEM((27 * pg, M), jnp.float32),            # im2col patches
        ],
        compiler_params=pltpu.CompilerParams(
            dimension_semantics=("parallel",)),               # 2 TCs on v7x
    )(x3, w1t, s1, b1, w2t, s2, b2, w3t, s3, b3, masks)

    return out3.reshape(N, Cout, D, H, W)                     # free reshape


# ----------------------------------------------------------------------------
# Pure-JAX reference & parameter construction
# ----------------------------------------------------------------------------

def bottleneck_reference(x_ncdhw, params):
    (w1, s1, b1, w2, s2, b2, w3, s3, b3) = params
    x = jnp.transpose(x_ncdhw, (0, 2, 3, 4, 1))               # NDHWC
    y = jnp.maximum(jnp.einsum('ndhwc,ce->ndhwe', x, w1) * s1[:, 0] + b1[:, 0], 0.0)
    y = lax.conv_general_dilated(
        y, w2, window_strides=(1, 1, 1), padding=((1, 1), (1, 1), (1, 1)),
        dimension_numbers=('NDHWC', 'DHWIO', 'NDHWC'))
    y = jnp.maximum(y * s2[:, 0] + b2[:, 0], 0.0)
    y = jnp.einsum('ndhwc,ce->ndhwe', y, w3) * s3[:, 0] + b3[:, 0] + x
    y = jnp.maximum(y, 0.0)
    return jnp.transpose(y, (0, 4, 1, 2, 3))


def _fold_bn(gamma, beta, mean, var, eps=1e-5):
    scale = gamma / jnp.sqrt(var + eps)
    bias = beta - mean * scale
    return scale[:, None], bias[:, None]      # (C, 1) columns for (C, M) layout


def make_params(key, inplanes, planes, expansion=4):
    # midplanes is only consumed by the Conv2Plus1D builder; Conv3DSimple
    # (used here) ignores it -- kept for fidelity with the module.
    midplanes = inplanes * planes * 3 * 3 * 3 // (inplanes * 3 * 3 + 3 * planes)
    del midplanes
    outplanes = planes * expansion
    ks = jax.random.split(key, 15)

    def bn(k0, k1, k2, k3, c):
        gamma = 0.5 + jax.random.uniform(k0, (c,), jnp.float32)
        beta = 0.1 * jax.random.normal(k1, (c,), jnp.float32)
        mean = 0.1 * jax.random.normal(k2, (c,), jnp.float32)
        var = 0.5 + jax.random.uniform(k3, (c,), jnp.float32)
        return _fold_bn(gamma, beta, mean, var)

    w1 = 0.1 * jax.random.normal(ks[0], (inplanes, planes), jnp.float32)
    s1, b1 = bn(ks[1], ks[2], ks[3], ks[4], planes)
    w2 = 0.1 * jax.random.normal(ks[5], (3, 3, 3, planes, planes), jnp.float32)
    s2, b2 = bn(ks[6], ks[7], ks[8], ks[9], planes)
    w3 = 0.1 * jax.random.normal(ks[10], (planes, outplanes), jnp.float32)
    s3, b3 = bn(ks[11], ks[12], ks[13], ks[14], outplanes)
    return (w1, s1, b1, w2, s2, b2, w3, s3, b3)


if __name__ == "__main__":
    N, inplanes, planes = 2, 16, 4
    D, H, W = 4, 8, 8

    key = jax.random.PRNGKey(0)
    kx, kp = jax.random.split(key)
    x = jax.random.normal(kx, (N, inplanes, D, H, W), jnp.float32)   # NCDHW
    params = make_params(kp, inplanes, planes)

    out = jax.block_until_ready(bottleneck_forward(x, params))
    ref = jax.block_until_ready(bottleneck_reference(x, params))

    assert out.shape == (N, planes * 4, D, H, W)
    assert jnp.allclose(out, ref, atol=1e-4, rtol=1e-4), (
        float(jnp.max(jnp.abs(out - ref))))

    print("KERNEL_OK")
</pallas_src>

<mosaic_0001>
module attributes {stable_mosaic.version = 11 : i64} {
  func.func @_bottleneck_kernel(%arg0: i32, %arg1: memref<1x16x256xf32, #tpu.memory_space<vmem>>, %arg2: memref<4x16xf32, #tpu.memory_space<vmem>>, %arg3: memref<4x1xf32, #tpu.memory_space<vmem>>, %arg4: memref<4x1xf32, #tpu.memory_space<vmem>>, %arg5: memref<4x216xf32, #tpu.memory_space<vmem>>, %arg6: memref<4x1xf32, #tpu.memory_space<vmem>>, %arg7: memref<4x1xf32, #tpu.memory_space<vmem>>, %arg8: memref<16x4xf32, #tpu.memory_space<vmem>>, %arg9: memref<16x1xf32, #tpu.memory_space<vmem>>, %arg10: memref<16x1xf32, #tpu.memory_space<vmem>>, %arg11: memref<27x256xf32, #tpu.memory_space<vmem>>, %arg12: memref<1x16x256xf32, #tpu.memory_space<vmem>>, %arg13: memref<4x512xf32, #tpu.memory_space<vmem>>, %arg14: memref<216x256xf32, #tpu.memory_space<vmem>>) attributes {dimension_semantics = [#tpu.dimension_semantics<parallel>], iteration_bounds = array<i64: 2>, scalar_prefetch = 0 : i64, scratch_operands = 2 : i64, tpu.core_type = #tpu.core_type<tc>, window_params = [{transform_indices = @transform_0, window_bounds = array<i64: 1, 16, 256>}, {pipeline_mode = #tpu.pipeline_mode<synchronous>, transform_indices = @transform_1, window_bounds = array<i64: 4, 16>}, {pipeline_mode = #tpu.pipeline_mode<synchronous>, transform_indices = @transform_2, window_bounds = array<i64: 4, 1>}, {pipeline_mode = #tpu.pipeline_mode<synchronous>, transform_indices = @transform_3, window_bounds = array<i64: 4, 1>}, {pipeline_mode = #tpu.pipeline_mode<synchronous>, transform_indices = @transform_4, window_bounds = array<i64: 4, 216>}, {pipeline_mode = #tpu.pipeline_mode<synchronous>, transform_indices = @transform_5, window_bounds = array<i64: 4, 1>}, {pipeline_mode = #tpu.pipeline_mode<synchronous>, transform_indices = @transform_6, window_bounds = array<i64: 4, 1>}, {pipeline_mode = #tpu.pipeline_mode<synchronous>, transform_indices = @transform_7, window_bounds = array<i64: 16, 4>}, {pipeline_mode = #tpu.pipeline_mode<synchronous>, transform_indices = @transform_8, window_bounds = array<i64: 16, 1>}, {pipeline_mode = #tpu.pipeline_mode<synchronous>, transform_indices = @transform_9, window_bounds = array<i64: 16, 1>}, {pipeline_mode = #tpu.pipeline_mode<synchronous>, transform_indices = @transform_10, window_bounds = array<i64: 27, 256>}, {transform_indices = @transform_11, window_bounds = array<i64: 1, 16, 256>}]} {
    %c0 = arith.constant 0 : index
    %c0_0 = arith.constant 0 : index
    %c0_1 = arith.constant 0 : index
    %0 = vector.load %arg1[%c0, %c0_0, %c0_1] : memref<1x16x256xf32, #tpu.memory_space<vmem>>, vector<1x16x256xf32>
    %1 = vector.shape_cast %0 : vector<1x16x256xf32> to vector<16x256xf32>
    %c0_2 = arith.constant 0 : index
    %c0_3 = arith.constant 0 : index
    %2 = vector.load %arg2[%c0_2, %c0_3] : memref<4x16xf32, #tpu.memory_space<vmem>>, vector<4x16xf32>
    %cst = arith.constant dense<0.000000e+00> : vector<4x256xf32>
    %3 = tpu.matmul %2, %1, %cst {dimension_numbers = #tpu.dot_dimension_numbers<[1], [0], [0], [1], [0, 0, 1, 1], [], []>} : vector<4x16xf32>, vector<16x256xf32>, vector<4x256xf32> -> vector<4x256xf32>
    %c0_4 = arith.constant 0 : index
    %c0_5 = arith.constant 0 : index
    %4 = vector.load %arg3[%c0_4, %c0_5] : memref<4x1xf32, #tpu.memory_space<vmem>>, vector<4x1xf32>
    %5 = vector.broadcast %4 : vector<4x1xf32> to vector<4x256xf32>
    %6 = arith.mulf %3, %5 : vector<4x256xf32>
    %c0_6 = arith.constant 0 : index
    %c0_7 = arith.constant 0 : index
    %7 = vector.load %arg4[%c0_6, %c0_7] : memref<4x1xf32, #tpu.memory_space<vmem>>, vector<4x1xf32>
    %8 = vector.broadcast %7 : vector<4x1xf32> to vector<4x256xf32>
    %9 = arith.addf %6, %8 : vector<4x256xf32>
    %cst_8 = arith.constant 0.000000e+00 : f32
    %10 = vector.broadcast %cst_8 : f32 to vector<4x256xf32>
    %11 = arith.maximumf %9, %10 : vector<4x256xf32>
    %cst_9 = arith.constant 0.000000e+00 : f32
    %12 = vector.broadcast %cst_9 : f32 to vector<4x512xf32>
    %c0_10 = arith.constant 0 : index
    %c0_11 = arith.constant 0 : index
    %13 = vector.load %arg13[%c0_10, %c0_11] : memref<4x512xf32, #tpu.memory_space<vmem>>, vector<4x512xf32>
    tpu.vector_store %arg13[%c0_10, %c0_11], %12 {strides = array<i32>} : memref<4x512xf32, #tpu.memory_space<vmem>>, vector<4x512xf32>,
    %c0_12 = arith.constant 0 : index
    %c128 = arith.constant 128 : index
    %14 = vector.load %arg13[%c0_12, %c128] : memref<4x512xf32, #tpu.memory_space<vmem>>, vector<4x256xf32>
    tpu.vector_store %arg13[%c0_12, %c128], %11 {strides = array<i32>} : memref<4x512xf32, #tpu.memory_space<vmem>>, vector<4x256xf32>,
    %cst_13 = arith.constant 0.000000e+00 : f32
    %15 = vector.broadcast %cst_13 : f32 to vector<216x256xf32>
    %c0_14 = arith.constant 0 : index
    %c0_15 = arith.constant 0 : index
    %16 = vector.load %arg14[%c0_14, %c0_15] : memref<216x256xf32, #tpu.memory_space<vmem>>, vector<216x256xf32>
    tpu.vector_store %arg14[%c0_14, %c0_15], %15 {strides = array<i32>} : memref<216x256xf32, #tpu.memory_space<vmem>>, vector<216x256xf32>,
    %c0_16 = arith.constant 0 : index
    %c55 = arith.constant 55 : index
    %17 = vector.load %arg13[%c0_16, %c55] : memref<4x512xf32, #tpu.memory_space<vmem>>, vector<4x256xf32>
    %c0_17 = arith.constant 0 : index
    %c0_18 = arith.constant 0 : index
    %18 = vector.load %arg11[%c0_17, %c0_18] : memref<27x256xf32, #tpu.memory_space<vmem>>, vector<1x256xf32>
    %19 = vector.broadcast %18 : vector<1x256xf32> to vector<4x256xf32>
    %20 = arith.mulf %17, %19 : vector<4x256xf32>
    %c0_19 = arith.constant 0 : index
    %c0_20 = arith.constant 0 : index
    %21 = vector.load %arg14[%c0_19, %c0_20] : memref<216x256xf32, #tpu.memory_space<vmem>>, vector<4x256xf32>
    tpu.vector_store %arg14[%c0_19, %c0_20], %20 {strides = array<i32>} : memref<216x256xf32, #tpu.memory_space<vmem>>, vector<4x256xf32>,
    %c0_21 = arith.constant 0 : index
    %c56 = arith.constant 56 : index
    %22 = vector.load %arg13[%c0_21, %c56] : memref<4x512xf32, #tpu.memory_space<vmem>>, vector<4x256xf32>
    %c1 = arith.constant 1 : index
    %c0_22 = arith.constant 0 : index
    %23 = vector.load %arg11[%c1, %c0_22] : memref<27x256xf32, #tpu.memory_space<vmem>>, vector<1x256xf32>
    %24 = vector.broadcast %23 : vector<1x256xf32> to vector<4x256xf32>
    %25 = arith.mulf %22, %24 : vector<4x256xf32>
    %c8 = arith.constant 8 : index
    %c0_23 = arith.constant 0 : index
    %26 = vector.load %arg14[%c8, %c0_23] : memref<216x256xf32, #tpu.memory_space<vmem>>, vector<4x256xf32>
    tpu.vector_store %arg14[%c8, %c0_23], %25 {strides = array<i32>} : memref<216x256xf32, #tpu.memory_space<vmem>>, vector<4x256xf32>,
    %c0_24 = arith.constant 0 : index
    %c57 = arith.constant 57 : index
    %27 = vector.load %arg13[%c0_24, %c57] : memref<4x512xf32, #tpu.memory_space<vmem>>, vector<4x256xf32>
    %c2 = arith.constant 2 : index
    %c0_25 = arith.constant 0 : index
    %28 = vector.load %arg11[%c2, %c0_25] : memref<27x256xf32, #tpu.memory_space<vmem>>, vector<1x256xf32>
    %29 = vector.broadcast %28 : vector<1x256xf32> to vector<4x256xf32>
    %30 = arith.mulf %27, %29 : vector<4x256xf32>
    %c16 = arith.constant 16 : index
    %c0_26 = arith.constant 0 : index
    %31 = vector.load %arg14[%c16, %c0_26] : memref<216x256xf32, #tpu.memory_space<vmem>>, vector<4x256xf32>
    tpu.vector_store %arg14[%c16, %c0_26], %30 {strides = array<i32>} : memref<216x256xf32, #tpu.memory_space<vmem>>, vector<4x256xf32>,
    %c0_27 = arith.constant 0 : index
    %c63 = arith.constant 63 : index
    %32 = vector.load %arg13[%c0_27, %c63] : memref<4x512xf32, #tpu.memory_space<vmem>>, vector<4x256xf32>
    %c3 = arith.constant 3 : index
    %c0_28 = arith.constant 0 : index
    %33 = vector.load %arg11[%c3, %c0_28] : memref<27x256xf32, #tpu.memory_space<vmem>>, vector<1x256xf32>
    %34 = vector.broadcast %33 : vector<1x256xf32> to vector<4x256xf32>
    %35 = arith.mulf %32, %34 : vector<4x256xf32>
    %c24 = arith.constant 24 : index
    %c0_29 = arith.constant 0 : index
    %36 = vector.load %arg14[%c24, %c0_29] : memref<216x256xf32, #tpu.memory_space<vmem>>, vector<4x256xf32>
    tpu.vector_store %arg14[%c24, %c0_29], %35 {strides = array<i32>} : memref<216x256xf32, #tpu.memory_space<vmem>>, vector<4x256xf32>,
    %c0_30 = arith.constant 0 : index
    %c64 = arith.constant 64 : index
    %37 = vector.load %arg13[%c0_30, %c64] : memref<4x512xf32, #tpu.memory_space<vmem>>, vector<4x256xf32>
    %c4 = arith.constant 4 : index
    %c0_31 = arith.constant 0 : index
    %38 = vector.load %arg11[%c4, %c0_31] : memref<27x256xf32, #tpu.memory_space<vmem>>, vector<1x256xf32>
    %39 = vector.broadcast %38 : vector<1x256xf32> to vector<4x256xf32>
    %40 = arith.mulf %37, %39 : vector<4x256xf32>
    %c32 = arith.constant 32 : index
    %c0_32 = arith.constant 0 : index
    %41 = vector.load %arg14[%c32, %c0_32] : memref<216x256xf32, #tpu.memory_space<vmem>>, vector<4x256xf32>
    tpu.vector_store %arg14[%c32, %c0_32], %40 {strides = array<i32>} : memref<216x256xf32, #tpu.memory_space<vmem>>, vector<4x256xf32>,
    %c0_33 = arith.constant 0 : index
    %c65 = arith.constant 65 : index
    %42 = vector.load %arg13[%c0_33, %c65] : memref<4x512xf32, #tpu.memory_space<vmem>>, vector<4x256xf32>
    %c5 = arith.constant 5 : index
    %c0_34 = arith.constant 0 : index
    %43 = vector.load %arg11[%c5, %c0_34] : memref<27x256xf32, #tpu.memory_space<vmem>>, vector<1x256xf32>
    %44 = vector.broadcast %43 : vector<1x256xf32> to vector<4x256xf32>
    %45 = arith.mulf %42, %44 : vector<4x256xf32>
    %c40 = arith.constant 40 : index
    %c0_35 = arith.constant 0 : index
    %46 = vector.load %arg14[%c40, %c0_35] : memref<216x256xf32, #tpu.memory_space<vmem>>, vector<4x256xf32>
    tpu.vector_store %arg14[%c40, %c0_35], %45 {strides = array<i32>} : memref<216x256xf32, #tpu.memory_space<vmem>>, vector<4x256xf32>,
    %c0_36 = arith.constant 0 : index
    %c71 = arith.constant 71 : index
    %47 = vector.load %arg13[%c0_36, %c71] : memref<4x512xf32, #tpu.memory_space<vmem>>, vector<4x256xf32>
    %c6 = arith.constant 6 : index
    %c0_37 = arith.constant 0 : index
    %48 = vector.load %arg11[%c6, %c0_37] : memref<27x256xf32, #tpu.memory_space<vmem>>, vector<1x256xf32>
    %49 = vector.broadcast %48 : vector<1x256xf32> to vector<4x256xf32>
    %50 = arith.mulf %47, %49 : vector<4x256xf32>
    %c48 = arith.constant 48 : index
    %c0_38 = arith.constant 0 : index
    %51 = vector.load %arg14[%c48, %c0_38] : memref<216x256xf32, #tpu.memory_space<vmem>>, vector<4x256xf32>
    tpu.vector_store %arg14[%c48, %c0_38], %50 {strides = array<i32>} : memref<216x256xf32, #tpu.memory_space<vmem>>, vector<4x256xf32>,
    %c0_39 = arith.constant 0 : index
    %c72 = arith.constant 72 : index
    %52 = vector.load %arg13[%c0_39, %c72] : memref<4x512xf32, #tpu.memory_space<vmem>>, vector<4x256xf32>
    %c7 = arith.constant 7 : index
    %c0_40 = arith.constant 0 : index
    %53 = vector.load %arg11[%c7, %c0_40] : memref<27x256xf32, #tpu.memory_space<vmem>>, vector<1x256xf32>
    %54 = vector.broadcast %53 : vector<1x256xf32> to vector<4x256xf32>
    %55 = arith.mulf %52, %54 : vector<4x256xf32>
    %c56_41 = arith.constant 56 : index
    %c0_42 = arith.constant 0 : index
    %56 = vector.load %arg14[%c56_41, %c0_42] : memref<216x256xf32, #tpu.memory_space<vmem>>, vector<4x256xf32>
    tpu.vector_store %arg14[%c56_41, %c0_42], %55 {strides = array<i32>} : memref<216x256xf32, #tpu.memory_space<vmem>>, vector<4x256xf32>,
    %c0_43 = arith.constant 0 : index
    %c73 = arith.constant 73 : index
    %57 = vector.load %arg13[%c0_43, %c73] : memref<4x512xf32, #tpu.memory_space<vmem>>, vector<4x256xf32>
    %c8_44 = arith.constant 8 : index
    %c0_45 = arith.constant 0 : index
    %58 = vector.load %arg11[%c8_44, %c0_45] : memref<27x256xf32, #tpu.memory_space<vmem>>, vector<1x256xf32>
    %59 = vector.broadcast %58 : vector<1x256xf32> to vector<4x256xf32>
    %60 = arith.mulf %57, %59 : vector<4x256xf32>
    %c64_46 = arith.constant 64 : index
    %c0_47 = arith.constant 0 : index
    %61 = vector.load %arg14[%c64_46, %c0_47] : memref<216x256xf32, #tpu.memory_space<vmem>>, vector<4x256xf32>
    tpu.vector_store %arg14[%c64_46, %c0_47], %60 {strides = array<i32>} : memref<216x256xf32, #tpu.memory_space<vmem>>, vector<4x256xf32>,
    %c0_48 = arith.constant 0 : index
    %c119 = arith.constant 119 : index
    %62 = vector.load %arg13[%c0_48, %c119] : memref<4x512xf32, #tpu.memory_space<vmem>>, vector<4x256xf32>
    %c9 = arith.constant 9 : index
    %c0_49 = arith.constant 0 : index
    %63 = vector.load %arg11[%c9, %c0_49] : memref<27x256xf32, #tpu.memory_space<vmem>>, vector<1x256xf32>
    %64 = vector.broadcast %63 : vector<1x256xf32> to vector<4x256xf32>
    %65 = arith.mulf %62, %64 : vector<4x256xf32>
    %c72_50 = arith.constant 72 : index
    %c0_51 = arith.constant 0 : index
    %66 = vector.load %arg14[%c72_50, %c0_51] : memref<216x256xf32, #tpu.memory_space<vmem>>, vector<4x256xf32>
    tpu.vector_store %arg14[%c72_50, %c0_51], %65 {strides = array<i32>} : memref<216x256xf32, #tpu.memory_space<vmem>>, vector<4x256xf32>,
    %c0_52 = arith.constant 0 : index
    %c120 = arith.constant 120 : index
    %67 = vector.load %arg13[%c0_52, %c120] : memref<4x512xf32, #tpu.memory_space<vmem>>, vector<4x256xf32>
    %c10 = arith.constant 10 : index
    %c0_53 = arith.constant 0 : index
    %68 = vector.load %arg11[%c10, %c0_53] : memref<27x256xf32, #tpu.memory_space<vmem>>, vector<1x256xf32>
    %69 = vector.broadcast %68 : vector<1x256xf32> to vector<4x256xf32>
    %70 = arith.mulf %67, %69 : vector<4x256xf32>
    %c80 = arith.constant 80 : index
    %c0_54 = arith.constant 0 : index
    %71 = vector.load %arg14[%c80, %c0_54] : memref<216x256xf32, #tpu.memory_space<vmem>>, vector<4x256xf32>
    tpu.vector_store %arg14[%c80, %c0_54], %70 {strides = array<i32>} : memref<216x256xf32, #tpu.memory_space<vmem>>, vector<4x256xf32>,
    %c0_55 = arith.constant 0 : index
    %c121 = arith.constant 121 : index
    %72 = vector.load %arg13[%c0_55, %c121] : memref<4x512xf32, #tpu.memory_space<vmem>>, vector<4x256xf32>
    %c11 = arith.constant 11 : index
    %c0_56 = arith.constant 0 : index
    %73 = vector.load %arg11[%c11, %c0_56] : memref<27x256xf32, #tpu.memory_space<vmem>>, vector<1x256xf32>
    %74 = vector.broadcast %73 : vector<1x256xf32> to vector<4x256xf32>
    %75 = arith.mulf %72, %74 : vector<4x256xf32>
    %c88 = arith.constant 88 : index
    %c0_57 = arith.constant 0 : index
    %76 = vector.load %arg14[%c88, %c0_57] : memref<216x256xf32, #tpu.memory_space<vmem>>, vector<4x256xf32>
    tpu.vector_store %arg14[%c88, %c0_57], %75 {strides = array<i32>} : memref<216x256xf32, #tpu.memory_space<vmem>>, vector<4x256xf32>,
    %c0_58 = arith.constant 0 : index
    %c127 = arith.constant 127 : index
    %77 = vector.load %arg13[%c0_58, %c127] : memref<4x512xf32, #tpu.memory_space<vmem>>, vector<4x256xf32>
    %c12 = arith.constant 12 : index
    %c0_59 = arith.constant 0 : index
    %78 = vector.load %arg11[%c12, %c0_59] : memref<27x256xf32, #tpu.memory_space<vmem>>, vector<1x256xf32>
    %79 = vector.broadcast %78 : vector<1x256xf32> to vector<4x256xf32>
    %80 = arith.mulf %77, %79 : vector<4x256xf32>
    %c96 = arith.constant 96 : index
    %c0_60 = arith.constant 0 : index
    %81 = vector.load %arg14[%c96, %c0_60] : memref<216x256xf32, #tpu.memory_space<vmem>>, vector<4x256xf32>
    tpu.vector_store %arg14[%c96, %c0_60], %80 {strides = array<i32>} : memref<216x256xf32, #tpu.memory_space<vmem>>, vector<4x256xf32>,
    %c0_61 = arith.constant 0 : index
    %c128_62 = arith.constant 128 : index
    %82 = vector.load %arg13[%c0_61, %c128_62] : memref<4x512xf32, #tpu.memory_space<vmem>>, vector<4x256xf32>
    %c13 = arith.constant 13 : index
    %c0_63 = arith.constant 0 : index
    %83 = vector.load %arg11[%c13, %c0_63] : memref<27x256xf32, #tpu.memory_space<vmem>>, vector<1x256xf32>
    %84 = vector.broadcast %83 : vector<1x256xf32> to vector<4x256xf32>
    %85 = arith.mulf %82, %84 : vector<4x256xf32>
    %c104 = arith.constant 104 : index
    %c0_64 = arith.constant 0 : index
    %86 = vector.load %arg14[%c104, %c0_64] : memref<216x256xf32, #tpu.memory_space<vmem>>, vector<4x256xf32>
    tpu.vector_store %arg14[%c104, %c0_64], %85 {strides = array<i32>} : memref<216x256xf32, #tpu.memory_space<vmem>>, vector<4x256xf32>,
    %c0_65 = arith.constant 0 : index
    %c129 = arith.constant 129 : index
    %87 = vector.load %arg13[%c0_65, %c129] : memref<4x512xf32, #tpu.memory_space<vmem>>, vector<4x256xf32>
    %c14 = arith.constant 14 : index
    %c0_66 = arith.constant 0 : index
    %88 = vector.load %arg11[%c14, %c0_66] : memref<27x256xf32, #tpu.memory_space<vmem>>, vector<1x256xf32>
    %89 = vector.broadcast %88 : vector<1x256xf32> to vector<4x256xf32>
    %90 = arith.mulf %87, %89 : vector<4x256xf32>
    %c112 = arith.constant 112 : index
    %c0_67 = arith.constant 0 : index
    %91 = vector.load %arg14[%c112, %c0_67] : memref<216x256xf32, #tpu.memory_space<vmem>>, vector<4x256xf32>
    tpu.vector_store %arg14[%c112, %c0_67], %90 {strides = array<i32>} : memref<216x256xf32, #tpu.memory_space<vmem>>, vector<4x256xf32>,
    %c0_68 = arith.constant 0 : index
    %c135 = arith.constant 135 : index
    %92 = vector.load %arg13[%c0_68, %c135] : memref<4x512xf32, #tpu.memory_space<vmem>>, vector<4x256xf32>
    %c15 = arith.constant 15 : index
    %c0_69 = arith.constant 0 : index
    %93 = vector.load %arg11[%c15, %c0_69] : memref<27x256xf32, #tpu.memory_space<vmem>>, vector<1x256xf32>
    %94 = vector.broadcast %93 : vector<1x256xf32> to vector<4x256xf32>
    %95 = arith.mulf %92, %94 : vector<4x256xf32>
    %c120_70 = arith.constant 120 : index
    %c0_71 = arith.constant 0 : index
    %96 = vector.load %arg14[%c120_70, %c0_71] : memref<216x256xf32, #tpu.memory_space<vmem>>, vector<4x256xf32>
    tpu.vector_store %arg14[%c120_70, %c0_71], %95 {strides = array<i32>} : memref<216x256xf32, #tpu.memory_space<vmem>>, vector<4x256xf32>,
    %c0_72 = arith.constant 0 : index
    %c136 = arith.constant 136 : index
    %97 = vector.load %arg13[%c0_72, %c136] : memref<4x512xf32, #tpu.memory_space<vmem>>, vector<4x256xf32>
    %c16_73 = arith.constant 16 : index
    %c0_74 = arith.constant 0 : index
    %98 = vector.load %arg11[%c16_73, %c0_74] : memref<27x256xf32, #tpu.memory_space<vmem>>, vector<1x256xf32>
    %99 = vector.broadcast %98 : vector<1x256xf32> to vector<4x256xf32>
    %100 = arith.mulf %97, %99 : vector<4x256xf32>
    %c128_75 = arith.constant 128 : index
    %c0_76 = arith.constant 0 : index
    %101 = vector.load %arg14[%c128_75, %c0_76] : memref<216x256xf32, #tpu.memory_space<vmem>>, vector<4x256xf32>
    tpu.vector_store %arg14[%c128_75, %c0_76], %100 {strides = array<i32>} : memref<216x256xf32, #tpu.memory_space<vmem>>, vector<4x256xf32>,
    %c0_77 = arith.constant 0 : index
    %c137 = arith.constant 137 : index
    %102 = vector.load %arg13[%c0_77, %c137] : memref<4x512xf32, #tpu.memory_space<vmem>>, vector<4x256xf32>
    %c17 = arith.constant 17 : index
    %c0_78 = arith.constant 0 : index
    %103 = vector.load %arg11[%c17, %c0_78] : memref<27x256xf32, #tpu.memory_space<vmem>>, vector<1x256xf32>
    %104 = vector.broadcast %103 : vector<1x256xf32> to vector<4x256xf32>
    %105 = arith.mulf %102, %104 : vector<4x256xf32>
    %c136_79 = arith.constant 136 : index
    %c0_80 = arith.constant 0 : index
    %106 = vector.load %arg14[%c136_79, %c0_80] : memref<216x256xf32, #tpu.memory_space<vmem>>, vector<4x256xf32>
    tpu.vector_store %arg14[%c136_79, %c0_80], %105 {strides = array<i32>} : memref<216x256xf32, #tpu.memory_space<vmem>>, vector<4x256xf32>,
    %c0_81 = arith.constant 0 : index
    %c183 = arith.constant 183 : index
    %107 = vector.load %arg13[%c0_81, %c183] : memref<4x512xf32, #tpu.memory_space<vmem>>, vector<4x256xf32>
    %c18 = arith.constant 18 : index
    %c0_82 = arith.constant 0 : index
    %108 = vector.load %arg11[%c18, %c0_82] : memref<27x256xf32, #tpu.memory_space<vmem>>, vector<1x256xf32>
    %109 = vector.broadcast %108 : vector<1x256xf32> to vector<4x256xf32>
    %110 = arith.mulf %107, %109 : vector<4x256xf32>
    %c144 = arith.constant 144 : index
    %c0_83 = arith.constant 0 : index
    %111 = vector.load %arg14[%c144, %c0_83] : memref<216x256xf32, #tpu.memory_space<vmem>>, vector<4x256xf32>
    tpu.vector_store %arg14[%c144, %c0_83], %110 {strides = array<i32>} : memref<216x256xf32, #tpu.memory_space<vmem>>, vector<4x256xf32>,
    %c0_84 = arith.constant 0 : index
    %c184 = arith.constant 184 : index
    %112 = vector.load %arg13[%c0_84, %c184] : memref<4x512xf32, #tpu.memory_space<vmem>>, vector<4x256xf32>
    %c19 = arith.constant 19 : index
    %c0_85 = arith.constant 0 : index
    %113 = vector.load %arg11[%c19, %c0_85] : memref<27x256xf32, #tpu.memory_space<vmem>>, vector<1x256xf32>
    %114 = vector.broadcast %113 : vector<1x256xf32> to vector<4x256xf32>
    %115 = arith.mulf %112, %114 : vector<4x256xf32>
    %c152 = arith.constant 152 : index
    %c0_86 = arith.constant 0 : index
    %116 = vector.load %arg14[%c152, %c0_86] : memref<216x256xf32, #tpu.memory_space<vmem>>, vector<4x256xf32>
    tpu.vector_store %arg14[%c152, %c0_86], %115 {strides = array<i32>} : memref<216x256xf32, #tpu.memory_space<vmem>>, vector<4x256xf32>,
    %c0_87 = arith.constant 0 : index
    %c185 = arith.constant 185 : index
    %117 = vector.load %arg13[%c0_87, %c185] : memref<4x512xf32, #tpu.memory_space<vmem>>, vector<4x256xf32>
    %c20 = arith.constant 20 : index
    %c0_88 = arith.constant 0 : index
    %118 = vector.load %arg11[%c20, %c0_88] : memref<27x256xf32, #tpu.memory_space<vmem>>, vector<1x256xf32>
    %119 = vector.broadcast %118 : vector<1x256xf32> to vector<4x256xf32>
    %120 = arith.mulf %117, %119 : vector<4x256xf32>
    %c160 = arith.constant 160 : index
    %c0_89 = arith.constant 0 : index
    %121 = vector.load %arg14[%c160, %c0_89] : memref<216x256xf32, #tpu.memory_space<vmem>>, vector<4x256xf32>
    tpu.vector_store %arg14[%c160, %c0_89], %120 {strides = array<i32>} : memref<216x256xf32, #tpu.memory_space<vmem>>, vector<4x256xf32>,
    %c0_90 = arith.constant 0 : index
    %c191 = arith.constant 191 : index
    %122 = vector.load %arg13[%c0_90, %c191] : memref<4x512xf32, #tpu.memory_space<vmem>>, vector<4x256xf32>
    %c21 = arith.constant 21 : index
    %c0_91 = arith.constant 0 : index
    %123 = vector.load %arg11[%c21, %c0_91] : memref<27x256xf32, #tpu.memory_space<vmem>>, vector<1x256xf32>
    %124 = vector.broadcast %123 : vector<1x256xf32> to vector<4x256xf32>
    %125 = arith.mulf %122, %124 : vector<4x256xf32>
    %c168 = arith.constant 168 : index
    %c0_92 = arith.constant 0 : index
    %126 = vector.load %arg14[%c168, %c0_92] : memref<216x256xf32, #tpu.memory_space<vmem>>, vector<4x256xf32>
    tpu.vector_store %arg14[%c168, %c0_92], %125 {strides = array<i32>} : memref<216x256xf32, #tpu.memory_space<vmem>>, vector<4x256xf32>,
    %c0_93 = arith.constant 0 : index
    %c192 = arith.constant 192 : index
    %127 = vector.load %arg13[%c0_93, %c192] : memref<4x512xf32, #tpu.memory_space<vmem>>, vector<4x256xf32>
    %c22 = arith.constant 22 : index
    %c0_94 = arith.constant 0 : index
    %128 = vector.load %arg11[%c22, %c0_94] : memref<27x256xf32, #tpu.memory_space<vmem>>, vector<1x256xf32>
    %129 = vector.broadcast %128 : vector<1x256xf32> to vector<4x256xf32>
    %130 = arith.mulf %127, %129 : vector<4x256xf32>
    %c176 = arith.constant 176 : index
    %c0_95 = arith.constant 0 : index
    %131 = vector.load %arg14[%c176, %c0_95] : memref<216x256xf32, #tpu.memory_space<vmem>>, vector<4x256xf32>
    tpu.vector_store %arg14[%c176, %c0_95], %130 {strides = array<i32>} : memref<216x256xf32, #tpu.memory_space<vmem>>, vector<4x256xf32>,
    %c0_96 = arith.constant 0 : index
    %c193 = arith.constant 193 : index
    %132 = vector.load %arg13[%c0_96, %c193] : memref<4x512xf32, #tpu.memory_space<vmem>>, vector<4x256xf32>
    %c23 = arith.constant 23 : index
    %c0_97 = arith.constant 0 : index
    %133 = vector.load %arg11[%c23, %c0_97] : memref<27x256xf32, #tpu.memory_space<vmem>>, vector<1x256xf32>
    %134 = vector.broadcast %133 : vector<1x256xf32> to vector<4x256xf32>
    %135 = arith.mulf %132, %134 : vector<4x256xf32>
    %c184_98 = arith.constant 184 : index
    %c0_99 = arith.constant 0 : index
    %136 = vector.load %arg14[%c184_98, %c0_99] : memref<216x256xf32, #tpu.memory_space<vmem>>, vector<4x256xf32>
    tpu.vector_store %arg14[%c184_98, %c0_99], %135 {strides = array<i32>} : memref<216x256xf32, #tpu.memory_space<vmem>>, vector<4x256xf32>,
    %c0_100 = arith.constant 0 : index
    %c199 = arith.constant 199 : index
    %137 = vector.load %arg13[%c0_100, %c199] : memref<4x512xf32, #tpu.memory_space<vmem>>, vector<4x256xf32>
    %c24_101 = arith.constant 24 : index
    %c0_102 = arith.constant 0 : index
    %138 = vector.load %arg11[%c24_101, %c0_102] : memref<27x256xf32, #tpu.memory_space<vmem>>, vector<1x256xf32>
    %139 = vector.broadcast %138 : vector<1x256xf32> to vector<4x256xf32>
    %140 = arith.mulf %137, %139 : vector<4x256xf32>
    %c192_103 = arith.constant 192 : index
    %c0_104 = arith.constant 0 : index
    %141 = vector.load %arg14[%c192_103, %c0_104] : memref<216x256xf32, #tpu.memory_space<vmem>>, vector<4x256xf32>
    tpu.vector_store %arg14[%c192_103, %c0_104], %140 {strides = array<i32>} : memref<216x256xf32, #tpu.memory_space<vmem>>, vector<4x256xf32>,
    %c0_105 = arith.constant 0 : index
    %c200 = arith.constant 200 : index
    %142 = vector.load %arg13[%c0_105, %c200] : memref<4x512xf32, #tpu.memory_space<vmem>>, vector<4x256xf32>
    %c25 = arith.constant 25 : index
    %c0_106 = arith.constant 0 : index
    %143 = vector.load %arg11[%c25, %c0_106] : memref<27x256xf32, #tpu.memory_space<vmem>>, vector<1x256xf32>
    %144 = vector.broadcast %143 : vector<1x256xf32> to vector<4x256xf32>
    %145 = arith.mulf %142, %144 : vector<4x256xf32>
    %c200_107 = arith.constant 200 : index
    %c0_108 = arith.constant 0 : index
    %146 = vector.load %arg14[%c200_107, %c0_108] : memref<216x256xf32, #tpu.memory_space<vmem>>, vector<4x256xf32>
    tpu.vector_store %arg14[%c200_107, %c0_108], %145 {strides = array<i32>} : memref<216x256xf32, #tpu.memory_space<vmem>>, vector<4x256xf32>,
    %c0_109 = arith.constant 0 : index
    %c201 = arith.constant 201 : index
    %147 = vector.load %arg13[%c0_109, %c201] : memref<4x512xf32, #tpu.memory_space<vmem>>, vector<4x256xf32>
    %c26 = arith.constant 26 : index
    %c0_110 = arith.constant 0 : index
    %148 = vector.load %arg11[%c26, %c0_110] : memref<27x256xf32, #tpu.memory_space<vmem>>, vector<1x256xf32>
    %149 = vector.broadcast %148 : vector<1x256xf32> to vector<4x256xf32>
    %150 = arith.mulf %147, %149 : vector<4x256xf32>
    %c208 = arith.constant 208 : index
    %c0_111 = arith.constant 0 : index
    %151 = vector.load %arg14[%c208, %c0_111] : memref<216x256xf32, #tpu.memory_space<vmem>>, vector<4x256xf32>
    tpu.vector_store %arg14[%c208, %c0_111], %150 {strides = array<i32>} : memref<216x256xf32, #tpu.memory_space<vmem>>, vector<4x256xf32>,
    %c0_112 = arith.constant 0 : index
    %c0_113 = arith.constant 0 : index
    %152 = vector.load %arg5[%c0_112, %c0_113] : memref<4x216xf32, #tpu.memory_space<vmem>>, vector<4x216xf32>
    %c0_114 = arith.constant 0 : index
    %c0_115 = arith.constant 0 : index
    %153 = vector.load %arg14[%c0_114, %c0_115] : memref<216x256xf32, #tpu.memory_space<vmem>>, vector<216x256xf32>
    %cst_116 = arith.constant dense<0.000000e+00> : vector<4x256xf32>
    %154 = tpu.matmul %152, %153, %cst_116 {dimension_numbers = #tpu.dot_dimension_numbers<[1], [0], [0], [1], [0, 0, 1, 1], [], []>} : vector<4x216xf32>, vector<216x256xf32>, vector<4x256xf32> -> vector<4x256xf32>
    %c0_117 = arith.constant 0 : index
    %c0_118 = arith.constant 0 : index
    %155 = vector.load %arg6[%c0_117, %c0_118] : memref<4x1xf32, #tpu.memory_space<vmem>>, vector<4x1xf32>
    %156 = vector.broadcast %155 : vector<4x1xf32> to vector<4x256xf32>
    %157 = arith.mulf %154, %156 : vector<4x256xf32>
    %c0_119 = arith.constant 0 : index
    %c0_120 = arith.constant 0 : index
    %158 = vector.load %arg7[%c0_119, %c0_120] : memref<4x1xf32, #tpu.memory_space<vmem>>, vector<4x1xf32>
    %159 = vector.broadcast %158 : vector<4x1xf32> to vector<4x256xf32>
    %160 = arith.addf %157, %159 : vector<4x256xf32>
    %cst_121 = arith.constant 0.000000e+00 : f32
    %161 = vector.broadcast %cst_121 : f32 to vector<4x256xf32>
    %162 = arith.maximumf %160, %161 : vector<4x256xf32>
    %c0_122 = arith.constant 0 : index
    %c0_123 = arith.constant 0 : index
    %163 = vector.load %arg8[%c0_122, %c0_123] : memref<16x4xf32, #tpu.memory_space<vmem>>, vector<16x4xf32>
    %cst_124 = arith.constant dense<0.000000e+00> : vector<16x256xf32>
    %164 = tpu.matmul %163, %162, %cst_124 {dimension_numbers = #tpu.dot_dimension_numbers<[1], [0], [0], [1], [0, 0, 1, 1], [], []>} : vector<16x4xf32>, vector<4x256xf32>, vector<16x256xf32> -> vector<16x256xf32>
    %c0_125 = arith.constant 0 : index
    %c0_126 = arith.constant 0 : index
    %165 = vector.load %arg9[%c0_125, %c0_126] : memref<16x1xf32, #tpu.memory_space<vmem>>, vector<16x1xf32>
    %166 = vector.broadcast %165 : vector<16x1xf32> to vector<16x256xf32>
    %167 = arith.mulf %164, %166 : vector<16x256xf32>
    %c0_127 = arith.constant 0 : index
    %c0_128 = arith.constant 0 : index
    %168 = vector.load %arg10[%c0_127, %c0_128] : memref<16x1xf32, #tpu.memory_space<vmem>>, vector<16x1xf32>
    %169 = vector.broadcast %168 : vector<16x1xf32> to vector<16x256xf32>
    %170 = arith.addf %167, %169 : vector<16x256xf32>
    %171 = arith.addf %170, %1 : vector<16x256xf32>
    %cst_129 = arith.constant 0.000000e+00 : f32
    %172 = vector.broadcast %cst_129 : f32 to vector<16x256xf32>
    %173 = arith.maximumf %171, %172 : vector<16x256xf32>
    %c0_130 = arith.constant 0 : index
    %c0_131 = arith.constant 0 : index
    %c0_132 = arith.constant 0 : index
    %174 = vector.load %arg12[%c0_130, %c0_131, %c0_132] : memref<1x16x256xf32, #tpu.memory_space<vmem>>, vector<1x16x256xf32>
    %175 = vector.shape_cast %174 : vector<1x16x256xf32> to vector<16x256xf32>
    %176 = vector.shape_cast %173 : vector<16x256xf32> to vector<1x16x256xf32>
    tpu.vector_store %arg12[%c0_130, %c0_131, %c0_132], %176 {strides = array<i32>} : memref<1x16x256xf32, #tpu.memory_space<vmem>>, vector<1x16x256xf32>,
    return
  }
  func.func @transform_0(%arg0: i32) -> (i32, i32, i32) {
    %c0_i32 = arith.constant 0 : i32
    %c0_i32_0 = arith.constant 0 : i32
    %c0_i32_1 = arith.constant 0 : i32
    return %arg0, %c0_i32, %c0_i32_0 : i32, i32, i32
  }
  func.func @transform_1(%arg0: i32) -> (i32, i32) {
    %c0_i32 = arith.constant 0 : i32
    %c0_i32_0 = arith.constant 0 : i32
    %c0_i32_1 = arith.constant 0 : i32
    return %c0_i32, %c0_i32_0 : i32, i32
  }
  func.func @transform_2(%arg0: i32) -> (i32, i32) {
    %c0_i32 = arith.constant 0 : i32
    %c0_i32_0 = arith.constant 0 : i32
    %c0_i32_1 = arith.constant 0 : i32
    return %c0_i32, %c0_i32_0 : i32, i32
  }
  func.func @transform_3(%arg0: i32) -> (i32, i32) {
    %c0_i32 = arith.constant 0 : i32
    %c0_i32_0 = arith.constant 0 : i32
    %c0_i32_1 = arith.constant 0 : i32
    return %c0_i32, %c0_i32_0 : i32, i32
  }
  func.func @transform_4(%arg0: i32) -> (i32, i32) {
    %c0_i32 = arith.constant 0 : i32
    %c0_i32_0 = arith.constant 0 : i32
    %c0_i32_1 = arith.constant 0 : i32
    return %c0_i32, %c0_i32_0 : i32, i32
  }
  func.func @transform_5(%arg0: i32) -> (i32, i32) {
    %c0_i32 = arith.constant 0 : i32
    %c0_i32_0 = arith.constant 0 : i32
    %c0_i32_1 = arith.constant 0 : i32
    return %c0_i32, %c0_i32_0 : i32, i32
  }
  func.func @transform_6(%arg0: i32) -> (i32, i32) {
    %c0_i32 = arith.constant 0 : i32
    %c0_i32_0 = arith.constant 0 : i32
    %c0_i32_1 = arith.constant 0 : i32
    return %c0_i32, %c0_i32_0 : i32, i32
  }
  func.func @transform_7(%arg0: i32) -> (i32, i32) {
    %c0_i32 = arith.constant 0 : i32
    %c0_i32_0 = arith.constant 0 : i32
    %c0_i32_1 = arith.constant 0 : i32
    return %c0_i32, %c0_i32_0 : i32, i32
  }
  func.func @transform_8(%arg0: i32) -> (i32, i32) {
    %c0_i32 = arith.constant 0 : i32
    %c0_i32_0 = arith.constant 0 : i32
    %c0_i32_1 = arith.constant 0 : i32
    return %c0_i32, %c0_i32_0 : i32, i32
  }
  func.func @transform_9(%arg0: i32) -> (i32, i32) {
    %c0_i32 = arith.constant 0 : i32
    %c0_i32_0 = arith.constant 0 : i32
    %c0_i32_1 = arith.constant 0 : i32
    return %c0_i32, %c0_i32_0 : i32, i32
  }
  func.func @transform_10(%arg0: i32) -> (i32, i32) {
    %c0_i32 = arith.constant 0 : i32
    %c0_i32_0 = arith.constant 0 : i32
    %c0_i32_1 = arith.constant 0 : i32
    return %c0_i32, %c0_i32_0 : i32, i32
  }
  func.func @transform_11(%arg0: i32) -> (i32, i32, i32) {
    %c0_i32 = arith.constant 0 : i32
    %c0_i32_0 = arith.constant 0 : i32
    %c0_i32_1 = arith.constant 0 : i32
    return %arg0, %c0_i32, %c0_i32_0 : i32, i32, i32
  }
}

</mosaic_0001>

<bundles_post_ra>
// kernel: bottleneck_forward.1
= control target key start
LH: loop header
LB: loop body
LE: loop exit
PB: predicated region body
PF: predicated region fallthrough
CT: control target
= control target key end

     0   :  { %s2051_s17 = smov 0   ;;  %s2893_s0 = inlined_call_operand.vmem [shape: f32[2,16,256], index: 0, kind: input, shape index: {}]   ;;  %s2894_s1 = inlined_call_operand.vmem [shape: f32[4,16], index: 1, kind: input, shape index: {}]   ;;  %s2895_s2 = inlined_call_operand.vmem [shape: f32[4,1], index: 2, kind: input, shape index: {}]   ;;  %s2896_s3 = inlined_call_operand.vmem [shape: f32[4,1], index: 3, kind: input, shape index: {}]   ;;  %s2897_s4 = inlined_call_operand.vmem [shape: f32[4,216], index: 4, kind: input, shape index: {}]   ;;  %s2898_s5 = inlined_call_operand.vmem [shape: f32[4,1], index: 5, kind: input, shape index: {}]   ;;  %s2899_s6 = inlined_call_operand.vmem [shape: f32[4,1], index: 6, kind: input, shape index: {}]   ;;  %s2900_s7 = inlined_call_operand.vmem [shape: f32[16,4], index: 7, kind: input, shape index: {}]   ;;  %s2901_s8 = inlined_call_operand.vmem [shape: f32[16,1], index: 8, kind: input, shape index: {}]   ;;  %s2902_s9 = inlined_call_operand.vmem [shape: f32[16,1], index: 9, kind: input, shape index: {}]   ;;  %s2903_s10 = inlined_call_operand.vmem [shape: f32[27,256], index: 10, kind: input, shape index: {}]   ;;  %s2904_s11 = inlined_call_operand.vmem [shape: f32[2,16,256], index: 11, kind: output, shape index: {}]  }
   0x1 LB: > { %s1885_s18 = sadd.s32 4294967295, %s1970_s17   ;;  %p1889_p0 = scmp.ge.s32.totalorder %s1970_s17, 1  ;;  %s1970_s17 = sphi %s2051_s17, %s21_s17  }
   0x2   : > { %p337_p1 = scmp.lt.s32.totalorder %s1970_s17, 3 }
   0x4   : > { %p338_p2 = pnand %p1889_p0, %p337_p1 }
   0x5   : > { %p2061_p3 = scmp.lt.s32.totalorder (!%p338_p2), %s1885_s18, 1  ;;  %s2908_s25 = smov (!%p338_p2), 7  }
   0x6   : > { %341 = sbr.rel (%p338_p2) target bundleno = 896 (0x380), region = 64  ;;  %s1975_s26 = smov (!%p338_p2), 127  }
   0x7   : > { %s2910_s13 = smov (!%p338_p2), 1   ;;  %s2906_s15 = smov (!%p338_p2), 120  }
   0x8   : > { %s1978_s22 = smov (!%p338_p2), 121   ;;  %s1979_s23 = smov (!%p338_p2), 73  }
   0x9   : > { %s1980_s12 = smov (!%p338_p2), 119   ;;  %s1981_s16 = smov (!%p338_p2), 71  }
   0xa   : > { %s1982_s27 = smov (!%p338_p2), 72   ;;  %s1983_s29 = smov (!%p338_p2), 64  }
   0xb   : > { %v550_v0 = vlaneseq  ;;  %v1972_v1 = vmov 0.0   ;;  %v1973_v2 = vmov 0   ;;  %v467_v3 = vld [vmem:[%s2895_s2] sm:$0xf]  ;;  %s2924_s18 = smov (!%p2061_p3, %s1885_s18), 1  ;;  %vm392_vm0 = vcmask 130048  }
   0xc   : > { %460 = vmatprep.mubr.f32.mxu0 %v1972_v1  ;;  %485 = vst [vmem:[#allocation2] sm:$0xff] %v1972_v1  ;;  %486 = vst [vmem:[#allocation2 + $0x8] sm:$0xff] %v1972_v1  ;;  %1957 = vset.pattern.permute.xlu0 %v1973_v2  ;;  %v475_v4 = vld [vmem:[%s2896_s3] sm:$0xf]  ;;  %s2905_s28 = sshll.u32 %s2924_s18, 5  ;;  %s1984_s24 = smov 65  }
   0xd   : > { %492 = vst [vmem:[#allocation3 + $0xb0] sm:$0xff] %v1972_v1  ;;  %493 = vst [vmem:[#allocation3 + $0xd0] sm:$0xff] %v1972_v1  ;;  %470 = vperm.xlu0 %1957, %v467_v3   ;;  %v551_v5 = vshrl.u32 %v550_v0, 7  ;;  %1958 = vset.pattern.permute.xlu1 %v1973_v2  ;;  %v1909_v6 = vld [vmem:[%s2903_s10 + $0x17] ss:$8 sm:$0x3]  ;;  %s2154_s14 = scalar_lea.vmem %s2893_s0, %s2905_s28 }
   0xe   : > { %494 = vst [vmem:[#allocation3 + $0x10] sm:$0xff] %v1972_v1  ;;  %495 = vst [vmem:[#allocation3 + $0x48] sm:$0xff] %v1972_v1  ;;  %v1908_v7 = vld [vmem:[%s2903_s10 + $0x16] ss:$8 sm:$0x3]  ;;  %v388_v14 = vld [vmem:[%s2154_s14 + $0x8] sm:$0xff] }
   0xf   : > { %496 = vst [vmem:[#allocation3 + $0x160] sm:$0xff] %v1972_v1  ;;  %497 = vst [vmem:[#allocation3 + $0x128] sm:$0xff] %v1972_v1  ;;  %v2142_v8 = vsub.s32 0, %v551_v5  ;;  %v2144_v9 = vsub.s32 1, %v551_v5  ;;  %v390_v12 = vld [vmem:[%s2154_s14 + $0x18] sm:$0xff]  ;;  %v389_v13 = vld [vmem:[%s2154_s14 + $0x10] sm:$0xff] }
  0x10   : > { %498 = vst [vmem:[#allocation3 + $0x40] sm:$0xff] %v1972_v1  ;;  %499 = vst [vmem:[#allocation3 + $0x178] sm:$0xff] %v1972_v1  ;;  %v1906_v10 = vld [vmem:[%s2903_s10 + $0x14] ss:$8 sm:$0x3]  ;;  %424 = vmatprep.subr.mxu0 %v390_v12  ;;  %v387_v20 = vld [vmem:[%s2154_s14] sm:$0xff] }
  0x11   : > { %500 = vst [vmem:[#allocation3 + $0x108] sm:$0xff] %v1972_v1  ;;  %501 = vst [vmem:[#allocation3 + $0x110] sm:$0xff] %v1972_v1  ;;  %v1904_v11 = vld [vmem:[%s2903_s10 + $0x12] ss:$8 sm:$0x3]  ;;  %478 = vperm.xlu0 %1957, %v475_v4   ;;  %v1108_v16 = vrot.slane %v1909_v6, %v2142_v8  ;;  %v1112_v17 = vrot.slane %v1909_v6, %v2144_v9  ;;  %v1071_v18 = vrot.slane %v1908_v7, %v2142_v8  ;;  %s1985_s28 = smov 57  }
  0x12   : > { %502 = vst [vmem:[#allocation3 + $0x90] sm:$0xff] %v1972_v1  ;;  %503 = vst [vmem:[#allocation3 + $0x118] sm:$0xff] %v1972_v1  ;;  %v391_v15 = vld [vmem:[%s2894_s1] sm:$0xf]  ;;  %v1075_v19 = vrot.slane %v1908_v7, %v2144_v9  ;;  %v1012_v21 = vrot.slane %v1906_v10, %v2142_v8  ;;  %v1016_v22 = vrot.slane %v1906_v10, %v2144_v9  ;;  %425 = vmatpush1.msra.mxu0 %v389_v13  ;;  %s1989_s30 = smov 9   ;;  %s1990_s19 = smov 8  }
  0x13   : > { %504 = vst [vmem:[#allocation3 + $0x148] sm:$0xff] %v1972_v1  ;;  %505 = vst [vmem:[#allocation3 + $0x100] sm:$0xff] %v1972_v1  ;;  %v1905_v23 = vld [vmem:[%s2903_s10 + $0x13] ss:$8 sm:$0x3]  ;;  %v1113_v24 = vcombine.low %v1108_v16, %v1112_v17  ;;  %v934_v25 = vrot.slane %v1904_v11, %v2142_v8  ;;  %v938_v26 = vrot.slane %v1904_v11, %v2144_v9  ;;  %426 = vmatprep.subr.mxu0 %v388_v14  ;;  %vm577_vm1 = vcmask 596992  }
  0x14   : > { %506 = vst [vmem:[#allocation3 + $0x58] sm:$0xff] %v1972_v1  ;;  %507 = vst [vmem:[#allocation3 + $0xd8] sm:$0xff] %v1972_v1  ;;  %v1902_v27 = vld [vmem:[%s2903_s10 + $0x10] ss:$8 sm:$0x3]  ;;  %v1017_v28 = vcombine.low %v1012_v21, %v1016_v22  ;;  %427 = vmatpush1.msra.mxu0 %v387_v20  ;;  %v1076_v29 = vcombine.low %v1071_v18, %v1075_v19  ;;  %v973_v30 = vrot.slane %v1905_v23, %v2142_v8  ;;  %vm655_vm2 = vcmask 580608  }
  0x15   : > { %508 = vst [vmem:[#allocation3 + $0x180] sm:$0xff] %v1972_v1  ;;  %509 = vst [vmem:[#allocation3 + $0x130] sm:$0xff] %v1972_v1  ;;  %1114 = vrot.lane.b32.xlu1 %v1113_v24, %s2908_s25  ;;  %v977_v31 = vrot.slane %v1905_v23, %v2144_v9  ;;  %1894 = vmatmul.mubr.msk.f32.vlgmr.msra.gmra.mxu0 %vm392_vm0, %v391_v15  ;;  %v939_v32 = vcombine.low %v934_v25, %v938_v26  ;;  %v1903_v33 = vld [vmem:[%s2903_s10 + $0x11] ss:$8 sm:$0x3]  ;;  %s1987_s25 = smov 55  }
  0x16   : > { %510 = vst [vmem:[#allocation3 + $0x138] sm:$0xff] %v1972_v1  ;;  %511 = vst [vmem:[#allocation3 + $0x78] sm:$0xff] %v1972_v1  ;;  %1018 = vrot.lane.b32.xlu0 %v1017_v28, %s1975_s26  ;;  %v858_v34 = vrot.slane %v1902_v27, %v2142_v8  ;;  %v862_v35 = vrot.slane %v1902_v27, %v2144_v9  ;;  %v1900_v36 = vld [vmem:[%s2903_s10 + $0x6] ss:$8 sm:$0x3]  ;;  %1773 = vmatprep.mubr.f32.mxu0 %v1972_v1  ;;  %vm616_vm3 = vcmask 588800  }
  0x17   : > { %512 = vst [vmem:[#allocation3 + $0x1a0] sm:$0xff] %v1972_v1  ;;  %513 = vst [vmem:[#allocation3 + $0x158] sm:$0xff] %v1972_v1  ;;  %v978_v37 = vcombine.low %v973_v30, %v977_v31  ;;  %v895_v38 = vrot.slane %v1903_v33, %v2142_v8  ;;  %v899_v39 = vrot.slane %v1903_v33, %v2144_v9  ;;  %v1901_v41 = vld [vmem:[%s2903_s10 + $0x7] ss:$8 sm:$0x3]  ;;  %vm718_vm4 = vcmask 523264  }
  0x18   : > { %514 = vst [vmem:[#allocation3 + $0x98] sm:$0xff] %v1972_v1  ;;  %515 = vst [vmem:[#allocation3 + $0xe8] sm:$0xff] %v1972_v1  ;;  %v863_v40 = vcombine.low %v858_v34, %v862_v35  ;;  %v784_v42 = vrot.slane %v1900_v36, %v2142_v8  ;;  %v788_v43 = vrot.slane %v1900_v36, %v2144_v9  ;;  %v1898_v44 = vld [vmem:[%s2903_s10 + $0x4] ss:$8 sm:$0x3]  ;;  %vm694_vm5 = vcmask 531456  }
  0x19   : > { %516 = vst [vmem:[#allocation3 + $0x80] sm:$0xff] %v1972_v1  ;;  %517 = vst [vmem:[#allocation3 + $0xa8] sm:$0xff] %v1972_v1  ;;  %1077 = vrot.lane.b32.xlu1 %v1076_v29, %s2910_s13  ;;  %v900_v45 = vcombine.low %v895_v38, %v899_v39  ;;  %v821_v46 = vrot.slane %v1901_v41, %v2142_v8  ;;  %v825_v47 = vrot.slane %v1901_v41, %v2144_v9  ;;  %v1899_v49 = vld [vmem:[%s2903_s10 + $0x5] ss:$8 sm:$0x3]  ;;  %s1988_s13 = smov 56  }
  0x1a   : > { %518 = vst [vmem:[#allocation3 + $0x28] sm:$0xff] %v1972_v1  ;;  %519 = vst [vmem:[#allocation3] sm:$0xff] %v1972_v1  ;;  %940 = vrot.lane.b32.xlu0 %v939_v32, %s2906_s15  ;;  %v789_v48 = vcombine.low %v784_v42, %v788_v43  ;;  %v709_v50 = vrot.slane %v1898_v44, %v2142_v8  ;;  %v713_v51 = vrot.slane %v1898_v44, %v2144_v9  ;;  %v1896_v52 = vld [vmem:[%s2903_s10 + $0x2] ss:$8 sm:$0x3]  ;;  %s1986_s15 = smov 63  }
  0x1b   : > { %520 = vst [vmem:[#allocation3 + $0x168] sm:$0xff] %v1972_v1  ;;  %521 = vst [vmem:[#allocation3 + $0xb8] sm:$0xff] %v1972_v1  ;;  %v826_v53 = vcombine.low %v821_v46, %v825_v47  ;;  %v747_v54 = vrot.slane %v1899_v49, %v2142_v8  ;;  %v751_v55 = vrot.slane %v1899_v49, %v2144_v9  ;;  %v1897_v57 = vld [vmem:[%s2903_s10 + $0x3] ss:$8 sm:$0x3]  ;;  %vm640_vm6 = vcmask 465920  }
  0x1c   : > { %522 = vst [vmem:[#allocation3 + $0x1a8] sm:$0xff] %v1972_v1  ;;  %523 = vst [vmem:[#allocation3 + $0x140] sm:$0xff] %v1972_v1  ;;  %v714_v56 = vcombine.low %v709_v50, %v713_v51  ;;  %v631_v58 = vrot.slane %v1896_v52, %v2142_v8  ;;  %v635_v59 = vrot.slane %v1896_v52, %v2144_v9  ;;  %v548_v60 = vld [vmem:[%s2903_s10] ss:$8 sm:$0x3]  ;;  %vm679_vm7 = vcmask 515072  }
  0x1d   : > { %524 = vst [vmem:[#allocation3 + $0x50] sm:$0xff] %v1972_v1  ;;  %525 = vst [vmem:[#allocation3 + $0xa0] sm:$0xff] %v1972_v1  ;;  %979 = vrot.lane.b32.xlu1 %v978_v37, %s1978_s22  ;;  %v752_v61 = vcombine.low %v747_v54, %v751_v55  ;;  %v670_v62 = vrot.slane %v1897_v57, %v2142_v8  ;;  %v674_v63 = vrot.slane %v1897_v57, %v2144_v9  ;;  %v1895_v2 = vld [vmem:[%s2903_s10 + $0x1] ss:$8 sm:$0x3]  ;;  %vm562_vm8 = vcmask 449536  }
  0x1e   : > { %526 = vst [vmem:[#allocation3 + $0x170] sm:$0xff] %v1972_v1  ;;  %527 = vst [vmem:[#allocation3 + $0x198] sm:$0xff] %v1972_v1  ;;  %864 = vrot.lane.b32.xlu0 %v863_v40, %s1979_s23  ;;  %v636_v0 = vcombine.low %v631_v58, %v635_v59  ;;  %v553_v3 = vrot.slane %v548_v60, %v2142_v8  ;;  %v557_v4 = vrot.slane %v548_v60, %v2144_v9  ;;  %v1919_v5 = vld [vmem:[%s2903_s10 + $0x31] ss:$8 sm:$0x3]  ;;  %vm601_vm9 = vcmask 457728  }
  0x1f   : > { %528 = vst [vmem:[#allocation3 + $0xc0] sm:$0xff] %v1972_v1  ;;  %529 = vst [vmem:[#allocation3 + $0x190] sm:$0xff] %v1972_v1  ;;  %v675_v6 = vcombine.low %v670_v62, %v674_v63  ;;  %v592_v7 = vrot.slane %v1895_v2, %v2142_v8  ;;  %v596_v10 = vrot.slane %v1895_v2, %v2144_v9  ;;  %v1920_v12 = vld [vmem:[%s2903_s10 + $0x32] ss:$8 sm:$0x3]  ;;  %vm919_vm10 = vcmask 72704  }
  0x20   : > { %530 = vst [vmem:[#allocation3 + $0xc8] sm:$0xff] %v1972_v1  ;;  %531 = vst [vmem:[#allocation3 + $0xf0] sm:$0xff] %v1972_v1  ;;  %v558_v11 = vcombine.low %v553_v3, %v557_v4  ;;  %v1478_v13 = vrot.slane %v1919_v5, %v2142_v8  ;;  %v1482_v14 = vrot.slane %v1919_v5, %v2144_v9  ;;  %v1917_v15 = vld [vmem:[%s2903_s10 + $0x27] ss:$8 sm:$0x3]  ;;  %vm997_vm11 = vcmask 56320  }
  0x21   : > { %532 = vst [vmem:[#allocation3 + $0x150] sm:$0xff] %v1972_v1  ;;  %533 = vst [vmem:[#allocation3 + $0x30] sm:$0xff] %v1972_v1  ;;  %901 = vrot.lane.b32.xlu1 %v900_v45, %s1980_s12  ;;  %v597_v16 = vcombine.low %v592_v7, %v596_v10  ;;  %v1515_v17 = vrot.slane %v1920_v12, %v2142_v8  ;;  %v1519_v18 = vrot.slane %v1920_v12, %v2144_v9  ;;  %v1918_v20 = vld [vmem:[%s2903_s10 + $0x30] ss:$8 sm:$0x3]  ;;  %vm1036_vm12 = vcmask 7168  }
  0x22   : > { %534 = vst [vmem:[#allocation3 + $0xf8] sm:$0xff] %v1972_v1  ;;  %535 = vst [vmem:[#allocation3 + $0x18] sm:$0xff] %v1972_v1  ;;  %790 = vrot.lane.b32.xlu0 %v789_v48, %s1981_s16  ;;  %v1483_v19 = vcombine.low %v1478_v13, %v1482_v14  ;;  %v1404_v21 = vrot.slane %v1917_v15, %v2142_v8  ;;  %v1408_v22 = vrot.slane %v1917_v15, %v2144_v9  ;;  %v1915_v23 = vld [vmem:[%s2903_s10 + $0x25] ss:$8 sm:$0x3]  ;;  %vm1021_vm13 = vcmask 1039360  }
  0x23   : > { %536 = vst [vmem:[#allocation3 + $0x8] sm:$0xff] %v1972_v1  ;;  %537 = vst [vmem:[#allocation3 + $0x60] sm:$0xff] %v1972_v1  ;;  %v1520_v24 = vcombine.low %v1515_v17, %v1519_v18  ;;  %v1441_v25 = vrot.slane %v1918_v20, %v2142_v8  ;;  %v1445_v26 = vrot.slane %v1918_v20, %v2144_v9  ;;  %v1916_v28 = vld [vmem:[%s2903_s10 + $0x26] ss:$8 sm:$0x3]  ;;  %vm982_vm14 = vcmask 990208  }
  0x24   : > { %538 = vst [vmem:[#allocation3 + $0x70] sm:$0xff] %v1972_v1  ;;  %539 = vst [vmem:[#allocation3 + $0x68] sm:$0xff] %v1972_v1  ;;  %v1409_v27 = vcombine.low %v1404_v21, %v1408_v22  ;;  %v1330_v29 = vrot.slane %v1915_v23, %v2142_v8  ;;  %v1334_v30 = vrot.slane %v1915_v23, %v2144_v9  ;;  %v1913_v31 = vld [vmem:[%s2903_s10 + $0x23] ss:$8 sm:$0x3]  ;;  %s2915_s20 = smov 1  }
  0x25   : > { %540 = vst [vmem:[#allocation3 + $0x38] sm:$0xff] %v1972_v1  ;;  %541 = vst [vmem:[#allocation3 + $0x20] sm:$0xff] %v1972_v1  ;;  %827 = vrot.lane.b32.xlu1 %v826_v53, %s1982_s27  ;;  %v1446_v32 = vcombine.low %v1441_v25, %v1445_v26  ;;  %v1367_v33 = vrot.slane %v1916_v28, %v2142_v8  ;;  %v1371_v34 = vrot.slane %v1916_v28, %v2144_v9  ;;  %v1914_v36 = vld [vmem:[%s2903_s10 + $0x24] ss:$8 sm:$0x3]  ;;  %vm2912_vm15 = vcmask 982016  }
  0x26   : > { %542 = vst [vmem:[#allocation3 + $0x88] sm:$0xff] %v1972_v1  ;;  %543 = vst [vmem:[#allocation3 + $0xe0] sm:$0xff] %v1972_v1  ;;  %715 = vrot.lane.b32.xlu0 %v714_v56, %s1983_s29  ;;  %v1335_v35 = vcombine.low %v1330_v29, %v1334_v30  ;;  %v1256_v37 = vrot.slane %v1913_v31, %v2142_v8  ;;  %v1260_v38 = vrot.slane %v1913_v31, %v2144_v9  ;;  %v1911_v39 = vld [vmem:[%s2903_s10 + $0x21] ss:$8 sm:$0x3]  ;;  %s2916_s21 = smov 7  }
  0x27   : > { %544 = vst [vmem:[#allocation3 + $0x120] sm:$0xff] %v1972_v1  ;;  %545 = vst [vmem:[#allocation3 + $0x188] sm:$0xff] %v1972_v1  ;;  %v1372_v40 = vcombine.low %v1367_v33, %v1371_v34  ;;  %v1293_v41 = vrot.slane %v1914_v36, %v2142_v8  ;;  %v1297_v42 = vrot.slane %v1914_v36, %v2144_v9  ;;  %v1912_v44 = vld [vmem:[%s2903_s10 + $0x22] ss:$8 sm:$0x3]  ;;  %vm2913_vm0 = vcmask 973824  }
  0x28   : > { %v1261_v43 = vcombine.low %v1256_v37, %v1260_v38  ;;  %v1182_v45 = vrot.slane %v1911_v39, %v2142_v8  ;;  %v1186_v46 = vrot.slane %v1911_v39, %v2144_v9  ;;  %v1219_v48 = vrot.slane %v1912_v44, %v2142_v8  ;;  %v1910_v51 = vld [vmem:[%s2903_s10 + $0x20] ss:$8 sm:$0x3]  ;;  %v1101_v57 = vld [vmem:[#allocation2 + $0xc] sm:$0xf] }
  0x29   : > { %753 = vrot.lane.b32.xlu1 %v752_v61, %s1984_s24  ;;  %v1298_v47 = vcombine.low %v1293_v41, %v1297_v42  ;;  %v1223_v49 = vrot.slane %v1912_v44, %v2144_v9  ;;  %v1145_v53 = vrot.slane %v1910_v51, %v2142_v8  ;;  %v1149_v54 = vrot.slane %v1910_v51, %v2144_v9  ;;  %v1064_v62 = vld [vmem:[#allocation2 + $0xc] sm:$0xf] }
  0x2a   : > { %637 = vrot.lane.b32.xlu0 %v636_v0, %s1985_s28  ;;  %v1187_v50 = vcombine.low %v1182_v45, %v1186_v46  ;;  %v1508_v18 = vld [vmem:[#allocation2 + $0xc] sm:$0xf] }
  0x2b   : > { %v1224_v52 = vcombine.low %v1219_v48, %v1223_v49  ;;  %v1150_v55 = vcombine.low %v1145_v53, %v1149_v54  ;;  %v1471_v26 = vld [vmem:[#allocation2 + $0xc] sm:$0xf] }
  0x2c   : > { %v1360_v34 = vld [vmem:[#allocation2 + $0xc] sm:$0xf] }
  0x2d   : > { %676 = vrot.lane.b32.xlu1 %v675_v6, %s1986_s15  ;;  %v1397_v36 = vld [vmem:[#allocation2 + $0xc] sm:$0xf] }
  0x2e   : > { %559 = vrot.lane.b32.xlu0 %v558_v11, %s1987_s25  ;;  %v1286_v44 = vld [vmem:[#allocation2 + $0xc] sm:$0xf] }
  0x2f   : > { %v1323_v46 = vld [vmem:[#allocation2 + $0xc] sm:$0xf] }
  0x30   : > { %v1212_v54 = vld [vmem:[#allocation2 + $0xc] sm:$0xf] }
  0x31   : > { %598 = vrot.lane.b32.xlu1 %v597_v16, %s1988_s13 }
  0x32   : > { %1484 = vrot.lane.b32.xlu0 %v1483_v19, %s1982_s27 }
  0x35   : > { %1521 = vrot.lane.b32.xlu1 %v1520_v24, %s1979_s23  ;;  %v1434_v24 = vld [vmem:[#allocation2 + $0xc] sm:$0xf] }
  0x36   : > { %1410 = vrot.lane.b32.xlu0 %v1409_v27, %s1984_s24 }
  0x39   : > { %1447 = vrot.lane.b32.xlu1 %v1446_v32, %s1981_s16 }
  0x3a   : > { %1336 = vrot.lane.b32.xlu0 %v1335_v35, %s1986_s15 }
  0x3d   : > { %1373 = vrot.lane.b32.xlu1 %v1372_v40, %s1983_s29 }
  0x3e   : > { %1262 = vrot.lane.b32.xlu0 %v1261_v43, %s1988_s13 }
  0x41   : > { %1299 = vrot.lane.b32.xlu1 %v1298_v47, %s1985_s28 }
  0x42   : > { %1188 = vrot.lane.b32.xlu0 %v1187_v50, %s1989_s30 }
  0x45   : > { %1225 = vrot.lane.b32.xlu1 %v1224_v52, %s1987_s25 }
  0x49   : > { %1151 = vrot.lane.b32.xlu1 %v1150_v55, %s1990_s19 }
  0x87   : > { %v2311_v56 = vpop.permute.xlu1 %1114 }
  0x88   : > { %v2313_v58 = vpop.permute.xlu0 %470  ;;  %v1116_v59 = vrot.slane %v2311_v56, 4 }
  0x8a   : > { %v1121_v60 = vmul.f32 %v1116_v59, %v1101_v57  ;;  %v1249_v57 = vld [vmem:[#allocation2 + $0xc] sm:$0xf] }
  0x8b   : > { %v2318_v61 = vpop.permute.xlu1 %1077 }
  0x8c   : > { %v2320_v63 = vpop.permute.xlu0 %478  ;;  %v1079_v0 = vrot.slane %v2318_v61, 4  ;;  %1129 = vrot.lane.b32.xlu1 %v1121_v60, %s1978_s22 }
  0x8e   : > { %v1084_v2 = vmul.f32 %v1079_v0, %v1064_v62 }
  0x8f   : > { %v2326_v3 = vpop.permute.xlu1 %979 }
  0x90   : > { %v2328_v4 = vpop.permute.xlu0 %1018  ;;  %1092 = vrot.lane.b32.xlu0 %v1084_v2, %s1975_s26 }
  0x93   : > { %v2331_v5 = vpop.permute.xlu1 %901 }
  0x94   : > { %v2333_v6 = vpop.permute.xlu0 %940 }
  0x97   : > { %v2335_v7 = vpop.permute.xlu1 %827 }
  0x98   : > { %v2337_v10 = vpop.permute.xlu0 %864 }
  0x9b   : > { %v2339_v11 = vpop.permute.xlu1 %753 }
  0x9c   : > { %v2341_v12 = vpop.permute.xlu0 %790 }
  0x9f   : > { %v2343_v13 = vpop.permute.xlu1 %676 }
  0xa0   : > { %v2345_v14 = vpop.permute.xlu0 %715 }
  0xa3   : > { %v2347_v15 = vpop.permute.xlu1 %598 }
  0xa4   : > { %v2349_v16 = vpop.permute.xlu0 %637 }
  0xa7   : > { %v1522_v17 = vpop.permute.xlu1 %1521 }
  0xa8   : > { %v2351_v19 = vpop.permute.xlu0 %559  ;;  %v1523_v20 = vrot.slane %v1522_v17, 4 }
  0xaa   : > { %v2354_v21 = vsel %vm577_vm1, %v1523_v20, %v1522_v17  ;;  %v1528_v22 = vmul.f32 %v1523_v20, %v1508_v18 }
  0xab   : > { %v1448_v23 = vpop.permute.xlu1 %1447 }
  0xac   : > { %v1485_v25 = vpop.permute.xlu0 %1484  ;;  %v1449_v27 = vrot.slane %v1448_v23, 4  ;;  %1536 = vrot.lane.b32.xlu0 %v1528_v22, %s1987_s25 }
  0xad   : > { %v1486_v28 = vrot.slane %v1485_v25, 4 }
  0xae   : > { %v2358_v29 = vsel %vm655_vm2, %v1449_v27, %v1448_v23  ;;  %v1454_v30 = vmul.f32 %v1449_v27, %v1434_v24  ;;  %v1175_v23 = vld [vmem:[#allocation2 + $0xc] sm:$0xf] }
  0xaf   : > { %v2361_v31 = vsel %vm616_vm3, %v1486_v28, %v1485_v25  ;;  %v1491_v32 = vmul.f32 %v1486_v28, %v1471_v26  ;;  %v1374_v33 = vpop.permute.xlu1 %1373 }
  0xb0   : > { %v1411_v35 = vpop.permute.xlu0 %1410  ;;  %v1375_v37 = vrot.slane %v1374_v33, 4  ;;  %1462 = vrot.lane.b32.xlu0 %v1454_v30, %s1985_s28 }
  0xb1   : > { %v1412_v38 = vrot.slane %v1411_v35, 4  ;;  %1499 = vrot.lane.b32.xlu1 %v1491_v32, %s1988_s13 }
  0xb2   : > { %v1376_v39 = vsel %vm718_vm4, %v1375_v37, %v1374_v33  ;;  %v1380_v40 = vmul.f32 %v1375_v37, %v1360_v34  ;;  %v1907_v34 = vld [vmem:[%s2903_s10 + $0x15] ss:$8 sm:$0x3] }
  0xb3   : > { %v1413_v41 = vsel %vm694_vm5, %v1412_v38, %v1411_v35  ;;  %v1417_v42 = vmul.f32 %v1412_v38, %v1397_v36  ;;  %v1300_v43 = vpop.permute.xlu1 %1299  ;;  %v1050_v37 = vrot.slane %v1907_v34, %v2142_v8  ;;  %v1054_v38 = vrot.slane %v1907_v34, %v2144_v9 }
  0xb4   : > { %v1337_v45 = vpop.permute.xlu0 %1336  ;;  %v1301_v47 = vrot.slane %v1300_v43, 4  ;;  %1388 = vrot.lane.b32.xlu0 %v1380_v40, %s1983_s29 }
  0xb5   : > { %v1338_v48 = vrot.slane %v1337_v45, 4  ;;  %1425 = vrot.lane.b32.xlu1 %v1417_v42, %s1986_s15 }
  0xb6   : > { %v1302_v49 = vsel %vm640_vm6, %v1301_v47, %v1300_v43  ;;  %v1306_v50 = vmul.f32 %v1301_v47, %v1286_v44 }
  0xb7   : > { %v1339_v51 = vsel %vm679_vm7, %v1338_v48, %v1337_v45  ;;  %v1343_v52 = vmul.f32 %v1338_v48, %v1323_v46  ;;  %v1226_v53 = vpop.permute.xlu1 %1225  ;;  %v1055_v45 = vcombine.low %v1050_v37, %v1054_v38  ;;  %v755_v37 = vrot.slane %v2339_v11, 4 }
  0xb8   : > { %v1263_v55 = vpop.permute.xlu0 %1262  ;;  %v1227_v60 = vrot.slane %v1226_v53, 4  ;;  %1314 = vrot.lane.b32.xlu0 %v1306_v50, %s1981_s16 }
  0xb9   : > { %v1264_v62 = vrot.slane %v1263_v55, 4  ;;  %1351 = vrot.lane.b32.xlu1 %v1343_v52, %s1984_s24 }
  0xba   : > { %v1228_v2 = vsel %vm562_vm8, %v1227_v60, %v1226_v53  ;;  %v1232_v17 = vmul.f32 %v1227_v60, %v1212_v54 }
  0xbb   : > { %v1265_v18 = vsel %vm601_vm9, %v1264_v62, %v1263_v55  ;;  %v1269_v20 = vmul.f32 %v1264_v62, %v1249_v57 }
  0xbc   : > { %v1189_v22 = vpop.permute.xlu0 %1188  ;;  %1240 = vrot.lane.b32.xlu0 %v1232_v17, %s1979_s23 }
  0xbd   : > { %v1190_v24 = vrot.slane %v1189_v22, 4  ;;  %1277 = vrot.lane.b32.xlu1 %v1269_v20, %s1982_s27 }
  0xbf   : > { %v1195_v25 = vmul.f32 %v1190_v24, %v1175_v23  ;;  %v1191_v42 = vsel %vm919_vm10, %v1190_v24, %v1189_v22  ;;  %v866_v23 = vrot.slane %v2337_v10, 4 }
  0xc1   : > { %1203 = vrot.lane.b32.xlu1 %v1195_v25, %s1980_s12 }
  0xd5   : > { %v462_v26 = vpop.f32.mrf.mxu0 }
  0xd6   : > { %v473_v27 = vmul.f32 %v2313_v58, %v462_v26  ;;  %v867_v26 = vsel %vm577_vm1, %v866_v23, %v2337_v10 }
  0xd7   : > { %v464_v28 = vpop.f32.mrf.mxu0 }
  0xd8   : > { %v481_v30 = vadd.f32 %v2320_v63, %v473_v27  ;;  %v474_v32 = vmul.f32 %v2313_v58, %v464_v28  ;;  %v829_v27 = vrot.slane %v2335_v7, 4 }
  0xda   : > { %v482_v33 = vadd.f32 %v2320_v63, %v474_v32  ;;  %v483_v35 = vmax.f32 %v481_v30, 0.0  ;;  %v830_v32 = vsel %vm616_vm3, %v829_v27, %v2335_v7 }
  0xdc   : > { %v484_v36 = vmax.f32 %v482_v33, 0.0  ;;  %v792_v33 = vrot.slane %v2341_v12, 4 }
  0xde   : > { %v2387_v40 = vcombine.low %v483_v35, %v484_v36  ;;  %v793_v36 = vsel %vm655_vm2, %v792_v33, %v2341_v12 }
  0xe0   : > { %491 = vst [vmem:[#allocation2 + $0x4] sm:$0xff] %v2387_v40  ;;  %v2392_v58 = vmul.f32 %v1339_v51, %v2387_v40  ;;  %v2395_v63 = vmul.f32 %v1376_v39, %v2387_v40  ;;  %v2398_v43 = vmul.f32 %v1413_v41, %v2387_v40  ;;  %v2402_v8 = vmul.f32 %v2358_v29, %v2387_v40 }
  0xe1   : > { %v2405_v9 = vmul.f32 %v1302_v49, %v2387_v40  ;;  %v2408_v44 = vmul.f32 %v1265_v18, %v2387_v40  ;;  %v1117_v39 = vsel %vm997_vm11, %v1116_v59, %v2311_v56  ;;  %v1080_v41 = vsel %vm1036_vm12, %v1079_v0, %v2318_v61 }
  0xe2   : > { %v2419_v29 = vmul.f32 %v1228_v2, %v2387_v40  ;;  %v2422_v46 = vmul.f32 %v1191_v42, %v2387_v40  ;;  %v2425_v47 = vmul.f32 %v1117_v39, %v2387_v40  ;;  %v2428_v48 = vmul.f32 %v1080_v41, %v2387_v40 }
  0xe3   : > { %v1020_v49 = vrot.slane %v2328_v4, 4  ;;  %v1057_v56 = vmul.f32 %v1055_v45, %v2387_v40  ;;  %v981_v0 = vrot.slane %v2326_v3, 4  ;;  %v903_v2 = vrot.slane %v2331_v5, 4 }
  0xe4   : > { %1125 = vrot.lane.b32.xlu0 %v2425_v47, %s1978_s22  ;;  %1088 = vrot.lane.b32.xlu1 %v2428_v48, %s1975_s26  ;;  %v756_v45 = vsel %vm694_vm5, %v755_v37, %v2339_v11  ;;  %v717_v39 = vrot.slane %v2345_v14, 4 }
  0xe5   : > { %v1022_v61 = vsel %vm1021_vm13, %v1020_v49, %v2328_v4  ;;  %1061 = vst [vmem:[#allocation3 + $0x28] sm:$0xf] %v1057_v56  ;;  %v983_v54 = vsel %vm982_vm14, %v981_v0, %v2326_v3  ;;  %v942_v4 = vrot.slane %v2333_v6, 4  ;;  %v1059_v20 = vcombine.high %v1057_v56, %v1057_v56 }
  0xe6   : > { %v905_v22 = vsel %vm2913_vm0, %v903_v2, %v2331_v5  ;;  %v719_v56 = vsel %vm718_vm4, %v717_v39, %v2345_v14  ;;  %vm1601_vm0 = vcmask 719872  }
  0xe7   : > { %v2436_v59 = vld [vmem:[#allocation2] sm:$0xff]  ;;  %v1005_v50 = vld [vmem:[#allocation2 + $0x8] sm:$0xf]  ;;  %v944_v62 = vsel %vm2912_vm15, %v942_v4, %v2333_v6  ;;  %1062 = vst [vmem:[#allocation3] sm:$0xf] %v1059_v20  ;;  %vm958_vm15 = vcmask 64512  }
  0xe8   : > { %v1026_v51 = vmul.f32 %v1020_v49, %v1005_v50  ;;  %v2442_v52 = vmul.f32 %v1022_v61, %v2436_v59  ;;  %v966_v53 = vld [vmem:[#allocation2 + $0x8] sm:$0xf]  ;;  %v2451_v57 = vmul.f32 %v983_v54, %v2436_v59  ;;  %v2460_v17 = vmul.f32 %v944_v62, %v2436_v59 }
  0xe9   : > { %v987_v55 = vmul.f32 %v981_v0, %v966_v53  ;;  %v927_v60 = vld [vmem:[#allocation2 + $0x8] sm:$0xf]  ;;  %v2469_v24 = vmul.f32 %v905_v22, %v2436_v59  ;;  %v2478_v5 = vmul.f32 %v867_v26, %v2436_v59  ;;  %v2487_v10 = vmul.f32 %v830_v32, %v2436_v59 }
  0xea   : > { %1034 = vrot.lane.b32.xlu1 %v1026_v51, %s2915_s20  ;;  %1030 = vrot.lane.b32.xlu0 %v2442_v52, %s2915_s20  ;;  %v948_v3 = vmul.f32 %v942_v4, %v927_v60  ;;  %v888_v18 = vld [vmem:[#allocation2 + $0x8] sm:$0xf]  ;;  %v2496_v7 = vmul.f32 %v793_v36, %v2436_v59  ;;  %v2505_v12 = vmul.f32 %v756_v45, %v2436_v59  ;;  %v678_v61 = vrot.slane %v2343_v13, 4 }
  0xeb   : > { %v909_v6 = vmul.f32 %v903_v2, %v888_v18  ;;  %v851_v25 = vld [vmem:[#allocation2 + $0x8] sm:$0xf]  ;;  %v2514_v11 = vmul.f32 %v719_v56, %v2436_v59  ;;  %v639_v53 = vrot.slane %v2349_v16, 4  ;;  %v600_v60 = vrot.slane %v2347_v15, 4 }
  0xec   : > { %v871_v28 = vmul.f32 %v866_v23, %v851_v25  ;;  %v814_v30 = vld [vmem:[#allocation2 + $0x8] sm:$0xf]  ;;  %v680_v51 = vsel %vm679_vm7, %v678_v61, %v2343_v13  ;;  %v561_v18 = vrot.slane %v2351_v19, 4  ;;  %v1527_v26 = vmul.f32 %v2354_v21, %v2387_v40 }
  0xed   : > { %v834_v34 = vmul.f32 %v829_v27, %v814_v30  ;;  %v777_v35 = vld [vmem:[#allocation2 + $0x8] sm:$0xf]  ;;  %v2523_v14 = vmul.f32 %v680_v51, %v2436_v59  ;;  %v1124_v21 = vcombine.high %v2425_v47, %v2425_v47  ;;  %v1029_v27 = vcombine.high %v2442_v52, %v2442_v52 }
  0xee   : > { %995 = vrot.lane.b32.xlu0 %v987_v55, %s2916_s21  ;;  %991 = vrot.lane.b32.xlu1 %v2451_v57, %s2916_s21  ;;  %v797_v38 = vmul.f32 %v792_v33, %v777_v35  ;;  %v740_v42 = vld [vmem:[#allocation2 + $0x8] sm:$0xf]  ;;  %v641_v55 = vsel %vm640_vm6, %v639_v53, %v2349_v16  ;;  %v563_v23 = vsel %vm562_vm8, %v561_v18, %v2351_v19 }
  0xef   : > { %v760_v41 = vmul.f32 %v755_v37, %v740_v42  ;;  %v702_v49 = vld [vmem:[#allocation2 + $0x8] sm:$0xf]  ;;  %v2532_v62 = vmul.f32 %v641_v55, %v2436_v59  ;;  %v1087_v19 = vcombine.high %v2428_v48, %v2428_v48  ;;  %v912_v47 = vcombine.high %v2469_v24, %v2469_v24 }
  0xf0   : > { %v723_v0 = vmul.f32 %v717_v39, %v702_v49  ;;  %v663_v50 = vld [vmem:[#allocation2 + $0x8] sm:$0xf]  ;;  %v951_v48 = vcombine.high %v2460_v17, %v2460_v17  ;;  %v837_v32 = vcombine.high %v2487_v10, %v2487_v10  ;;  %v874_v33 = vcombine.high %v2478_v5, %v2478_v5 }
  0xf1   : > { %v684_v54 = vmul.f32 %v678_v61, %v663_v50  ;;  %v624_v4 = vld [vmem:[#allocation2 + $0x8] sm:$0xf]  ;;  %v1531_v42 = vcombine.high %v1527_v26, %v1527_v26  ;;  %v1309_v51 = vcombine.high %v2405_v9, %v2405_v9  ;;  %v1198_v55 = vcombine.high %v2422_v46, %v2422_v46 }
  0xf2   : > { %956 = vrot.lane.b32.xlu1 %v948_v3, %s1990_s19  ;;  %952 = vrot.lane.b32.xlu0 %v2460_v17, %s1990_s19  ;;  %v645_v13 = vmul.f32 %v639_v53, %v624_v4  ;;  %v585_v2 = vld [vmem:[#allocation2 + $0x8] sm:$0xf]  ;;  %v602_v3 = vsel %vm601_vm9, %v600_v60, %v2347_v15  ;;  %v1490_v15 = vmul.f32 %v2361_v31, %v2387_v40  ;;  %v2574_v31 = vpop.permute.xlu1 %1151 }
  0xf3   : > { %v605_v20 = vmul.f32 %v602_v3, %v2436_v59  ;;  %v606_v16 = vmul.f32 %v600_v60, %v585_v2  ;;  %v547_v22 = vld [vmem:[#allocation2 + $0x8] sm:$0xf]  ;;  %v763_v17 = vcombine.high %v2505_v12, %v2505_v12  ;;  %v1153_v50 = vrot.slane %v2574_v31, 4 }
  0xf4   : > { %v567_v25 = vmul.f32 %v561_v18, %v547_v22  ;;  %v1494_v49 = vcombine.high %v1490_v15, %v1490_v15  ;;  %v1675_v18 = vld [vmem:[%s2898_s5] sm:$0xf] }
  0xf5   : > { %v1786_v22 = vld [vmem:[%s2901_s8] sm:$0xff] }
  0xf6   : > { %917 = vrot.lane.b32.xlu0 %v909_v6, %s1989_s30  ;;  %913 = vrot.lane.b32.xlu1 %v2469_v24, %s1989_s30  ;;  %v566_v6 = vmul.f32 %v563_v23, %v2436_v59  ;;  %v990_v59 = vcombine.high %v2451_v57, %v2451_v57  ;;  %v800_v24 = vcombine.high %v2496_v7, %v2496_v7 }
  0xf8   : > { %v570_v45 = vcombine.high %v566_v6, %v566_v6 }
  0xfa   : > { %879 = vrot.lane.b32.xlu1 %v871_v28, %s1987_s25  ;;  %875 = vrot.lane.b32.xlu0 %v2478_v5, %s1987_s25  ;;  %v687_v5 = vcombine.high %v2523_v14, %v2523_v14 }
  0xfe   : > { %842 = vrot.lane.b32.xlu0 %v834_v34, %s1988_s13  ;;  %838 = vrot.lane.b32.xlu1 %v2487_v10, %s1988_s13  ;;  %v2582_v28 = vpop.permute.xlu1 %1129  ;;  %v726_v10 = vcombine.high %v2514_v11, %v2514_v11 }
 0x102   : > { %805 = vrot.lane.b32.xlu1 %v797_v38, %s1985_s28  ;;  %801 = vrot.lane.b32.xlu0 %v2496_v7, %s1985_s28  ;;  %v2584_v30 = vpop.permute.xlu0 %1092  ;;  %v609_v38 = vcombine.high %v605_v20, %v605_v20  ;;  %v648_v7 = vcombine.high %v2532_v62, %v2532_v62 }
 0x106   : > { %768 = vrot.lane.b32.xlu0 %v760_v41, %s1986_s15  ;;  %764 = vrot.lane.b32.xlu1 %v2505_v12, %s1986_s15  ;;  %v1457_v12 = vcombine.high %v2402_v8, %v2402_v8 }
 0x10a   : > { %731 = vrot.lane.b32.xlu1 %v723_v0, %s1983_s29  ;;  %727 = vrot.lane.b32.xlu0 %v2514_v11, %s1983_s29  ;;  %v1383_v0 = vcombine.high %v2395_v63, %v2395_v63  ;;  %v1420_v11 = vcombine.high %v2398_v43, %v2398_v43 }
 0x10e   : > { %692 = vrot.lane.b32.xlu0 %v684_v54, %s1984_s24  ;;  %688 = vrot.lane.b32.xlu1 %v2523_v14, %s1984_s24 }
 0x112   : > { %653 = vrot.lane.b32.xlu1 %v645_v13, %s1981_s16  ;;  %649 = vrot.lane.b32.xlu0 %v2532_v62, %s1981_s16  ;;  %v1138_v13 = vld [vmem:[#allocation2 + $0xc] sm:$0xf] }
 0x116   : > { %614 = vrot.lane.b32.xlu0 %v606_v16, %s1982_s27  ;;  %610 = vrot.lane.b32.xlu1 %v605_v20, %s1982_s27 }
 0x11a   : > { %575 = vrot.lane.b32.xlu1 %v567_v25, %s1979_s23  ;;  %571 = vrot.lane.b32.xlu0 %v566_v6, %s1979_s23  ;;  %v1683_v25 = vld [vmem:[%s2899_s6] sm:$0xf] }
 0x11e   : > { %1532 = vrot.lane.b32.xlu1 %v1527_v26, %s1987_s25  ;;  %1495 = vrot.lane.b32.xlu0 %v1490_v15, %s1988_s13  ;;  %v2596_v52 = vpop.permute.xlu0 %1536  ;;  %v1802_v15 = vld [vmem:[%s2902_s9] sm:$0xff]  ;;  %v1787_v26 = vld [vmem:[%s2901_s8 + $0x8] sm:$0xff] }
 0x122   : > { %1458 = vrot.lane.b32.xlu1 %v2402_v8, %s1985_s28  ;;  %1421 = vrot.lane.b32.xlu0 %v2398_v43, %s1986_s15  ;;  %v2610_v35 = vpop.permute.xlu0 %1462  ;;  %v1346_v8 = vcombine.high %v2392_v58, %v2392_v58  ;;  %v1272_v43 = vcombine.high %v2408_v44, %v2408_v44 }
 0x123   : > { %v2594_v57 = vpop.permute.xlu1 %1499 }
 0x126   : > { %1384 = vrot.lane.b32.xlu1 %v2395_v63, %s1983_s29  ;;  %1347 = vrot.lane.b32.xlu0 %v2392_v58, %s1984_s24  ;;  %v2622_v37 = vpop.permute.xlu0 %1388  ;;  %v1154_v63 = vsel %vm958_vm15, %v1153_v50, %v2574_v31  ;;  %v1235_v58 = vcombine.high %v2419_v29, %v2419_v29  ;;  %v1803_v31 = vld [vmem:[%s2902_s9 + $0x8] sm:$0xff] }
 0x127   : > { %v2608_v34 = vpop.permute.xlu1 %1425  ;;  %v1157_v14 = vmul.f32 %v1154_v63, %v2387_v40  ;;  %v2683_v40 = vld [vmem:[%s2897_s4] sm:$0xff] }
 0x129   : > { %v1161_v60 = vcombine.high %v1157_v14, %v1157_v14 }
 0x12a   : > { %1310 = vrot.lane.b32.xlu1 %v2405_v9, %s1981_s16  ;;  %1273 = vrot.lane.b32.xlu0 %v2408_v44, %s1982_s27  ;;  %v2630_v41 = vpop.permute.xlu0 %1314 }
 0x12b   : > { %v2620_v36 = vpop.permute.xlu1 %1351 }
 0x12e   : > { %1236 = vrot.lane.b32.xlu1 %v2419_v29, %s1979_s23  ;;  %1199 = vrot.lane.b32.xlu0 %v2422_v46, %s1980_s12  ;;  %v2640_v61 = vpop.permute.xlu0 %1240  ;;  %v1158_v29 = vmul.f32 %v1153_v50, %v1138_v13  ;;  %v1600_v46 = vcombine.high %v2683_v40, %v2683_v40 }
 0x12f   : > { %v2628_v39 = vpop.permute.xlu1 %1277 }
 0x130   : > { %1921 = vmatprep.mubr.msk.f32.mxu1 %vm1601_vm0, %v1600_v46 }
 0x132   : > { %1090 = vrot.lane.b32.xlu1 %v1087_v19, %s1975_s26  ;;  %1127 = vrot.lane.b32.xlu0 %v1124_v21, %s1978_s22 }
 0x133   : > { %v2638_v56 = vpop.permute.xlu1 %1203 }
 0x136   : > { %993 = vrot.lane.b32.xlu1 %v990_v59, %s2916_s21  ;;  %1032 = vrot.lane.b32.xlu0 %v1029_v27, %s2915_s20 }
 0x13a   : > { %915 = vrot.lane.b32.xlu1 %v912_v47, %s1989_s30  ;;  %954 = vrot.lane.b32.xlu0 %v951_v48, %s1990_s19 }
 0x13e   : > { %840 = vrot.lane.b32.xlu1 %v837_v32, %s1988_s13  ;;  %877 = vrot.lane.b32.xlu0 %v874_v33, %s1987_s25 }
 0x142   : > { %766 = vrot.lane.b32.xlu1 %v763_v17, %s1986_s15  ;;  %803 = vrot.lane.b32.xlu0 %v800_v24, %s1985_s28 }
 0x146   : > { %690 = vrot.lane.b32.xlu1 %v687_v5, %s1984_s24  ;;  %729 = vrot.lane.b32.xlu0 %v726_v10, %s1983_s29 }
 0x14a   : > { %612 = vrot.lane.b32.xlu1 %v609_v38, %s1982_s27  ;;  %651 = vrot.lane.b32.xlu0 %v648_v7, %s1981_s16 }
 0x14e   : > { %1534 = vrot.lane.b32.xlu1 %v1531_v42, %s1987_s25  ;;  %573 = vrot.lane.b32.xlu0 %v570_v45, %s1979_s23 }
 0x152   : > { %1460 = vrot.lane.b32.xlu1 %v1457_v12, %s1985_s28  ;;  %1497 = vrot.lane.b32.xlu0 %v1494_v49, %s1988_s13  ;;  %s2917_s28 = smov 120   ;;  %s2922_s13 = sshll.u32 %s2924_s18, 5 }
 0x156   : > { %1386 = vrot.lane.b32.xlu1 %v1383_v0, %s1983_s29  ;;  %1423 = vrot.lane.b32.xlu0 %v1420_v11, %s1986_s15  ;;  %v2653_v53 = vpop.permute.xlu0 %1125  ;;  %v2655_v54 = vpop.permute.xlu1 %1088 }
 0x15a   : > { %1312 = vrot.lane.b32.xlu1 %v1309_v51, %s1981_s16  ;;  %1349 = vrot.lane.b32.xlu0 %v1346_v8, %s1984_s24 }
 0x15c   : > { %v2666_v9 = vpop.permute.xlu1 %1034  ;;  %v2668_v4 = vpop.permute.xlu0 %1030 }
 0x15e   : > { %1238 = vrot.lane.b32.xlu1 %v1235_v58, %s1979_s23  ;;  %1275 = vrot.lane.b32.xlu0 %v1272_v43, %s1982_s27  ;;  %s386_s23 = scalar_lea.vmem %s2904_s11, %s2922_s13 }
 0x160   : > { %v2674_v62 = vpop.permute.xlu0 %995  ;;  %v2676_v44 = vpop.permute.xlu1 %991 }
 0x162   : > { %1164 = vrot.lane.b32.xlu1 %v1161_v60, %s2917_s28  ;;  %1201 = vrot.lane.b32.xlu0 %v1198_v55, %s1980_s12 }
 0x164   : > { %v2685_v2 = vpop.permute.xlu1 %956  ;;  %v2687_v3 = vpop.permute.xlu0 %952 }
 0x166   : > { %1162 = vrot.lane.b32.xlu1 %v1157_v14, %s2917_s28  ;;  %1166 = vrot.lane.b32.xlu0 %v1158_v29, %s2917_s28 }
 0x168   : > { %v2696_v20 = vpop.permute.xlu0 %917  ;;  %v2698_v16 = vpop.permute.xlu1 %913 }
 0x16a   : > { %1678 = vperm.xlu0 %1957, %v1675_v18   ;;  %1686 = vperm.xlu1 %1958, %v1683_v25  }
 0x16c   : > { %v2703_v23 = vpop.permute.xlu1 %879  ;;  %v2705_v6 = vpop.permute.xlu0 %875 }
 0x16e   : > { %1790 = vperm.xlu0 %1957, %v1786_v22   ;;  %1795 = vperm.xlu1 %1958, %v1787_v26  }
 0x170   : > { %v2716_v19 = vpop.permute.xlu0 %842  ;;  %v2718_v21 = vpop.permute.xlu1 %838 }
 0x172   : > { %1806 = vperm.xlu0 %1957, %v1802_v15   ;;  %1811 = vperm.xlu1 %1958, %v1803_v31  }
 0x174   : > { %v2723_v59 = vpop.permute.xlu1 %805  ;;  %v2725_v27 = vpop.permute.xlu0 %801 }
 0x178   : > { %v2727_v47 = vpop.permute.xlu0 %768  ;;  %v2729_v48 = vpop.permute.xlu1 %764 }
 0x17c   : > { %v2731_v32 = vpop.permute.xlu1 %731  ;;  %v2733_v33 = vpop.permute.xlu0 %727 }
 0x180   : > { %v2735_v17 = vpop.permute.xlu0 %692  ;;  %v2737_v24 = vpop.permute.xlu1 %688 }
 0x184   : > { %v2739_v5 = vpop.permute.xlu1 %653  ;;  %v2741_v10 = vpop.permute.xlu0 %649 }
 0x188   : > { %v2743_v38 = vpop.permute.xlu0 %614  ;;  %v2745_v7 = vpop.permute.xlu1 %610 }
 0x18c   : > { %v2747_v42 = vpop.permute.xlu1 %575  ;;  %v2749_v45 = vpop.permute.xlu0 %571 }
 0x190   : > { %v2751_v12 = vpop.permute.xlu1 %1532  ;;  %v2753_v49 = vpop.permute.xlu0 %1495 }
 0x194   : > { %v2755_v0 = vpop.permute.xlu1 %1458  ;;  %v2757_v11 = vpop.permute.xlu0 %1421 }
 0x198   : > { %v2759_v50 = vpop.permute.xlu1 %1384  ;;  %v2761_v8 = vpop.permute.xlu0 %1347 }
 0x19c   : > { %v2763_v51 = vpop.permute.xlu1 %1310  ;;  %v2765_v63 = vpop.permute.xlu0 %1273 }
 0x1a0   : > { %v2767_v43 = vpop.permute.xlu1 %1236  ;;  %v2769_v58 = vpop.permute.xlu0 %1199 }
 0x1a4   : > { %v1091_v14 = vpop.permute.xlu1 %1090  ;;  %v1128_v55 = vpop.permute.xlu0 %1127 }
 0x1a5   : > { %v1094_v60 = vsel %vm1021_vm13, %v2655_v54, %v1091_v14  ;;  %v1095_v13 = vsel %vm1021_vm13, %v1091_v14, %v2584_v30  ;;  %v1131_v29 = vsel %vm982_vm14, %v2653_v53, %v1128_v55  ;;  %v1132_v46 = vsel %vm982_vm14, %v1128_v55, %v2582_v28 }
 0x1a6   : > { %1098 = vst [vmem:[#allocation3 + $0x168] sm:$0xf] %v1094_v60  ;;  %1099 = vst [vmem:[#allocation3 + $0xb8] sm:$0xf] %v1095_v13 }
 0x1a7   : > { %1135 = vst [vmem:[#allocation3 + $0x1a8] sm:$0xf] %v1131_v29  ;;  %1136 = vst [vmem:[#allocation3 + $0x140] sm:$0xf] %v1132_v46  ;;  %v1572_v29 = vld [vmem:[#allocation3] sm:$0xff]  ;;  %v1571_v46 = vld [vmem:[#allocation3 + $0x28] sm:$0xff] }
 0x1a8   : > { %v994_v18 = vpop.permute.xlu1 %993  ;;  %v1033_v22 = vpop.permute.xlu0 %1032 }
 0x1a9   : > { %v998_v25 = vsel %vm997_vm11, %v2676_v44, %v994_v18  ;;  %v999_v54 = vsel %vm997_vm11, %v994_v18, %v2674_v62  ;;  %v1037_v30 = vsel %vm1036_vm12, %v2668_v4, %v1033_v22  ;;  %v1038_v53 = vsel %vm1036_vm12, %v1033_v22, %v2666_v9 }
 0x1aa   : > { %1002 = vst [vmem:[#allocation3 + $0x98] sm:$0xf] %v998_v25  ;;  %1003 = vst [vmem:[#allocation3 + $0xe8] sm:$0xf] %v999_v54 }
 0x1ab   : > { %1041 = vst [vmem:[#allocation3 + $0x80] sm:$0xf] %v1037_v30  ;;  %1042 = vst [vmem:[#allocation3 + $0xa8] sm:$0xf] %v1038_v53 }
 0x1ac   : > { %v916_v28 = vpop.permute.xlu1 %915  ;;  %v955_v15 = vpop.permute.xlu0 %954 }
 0x1ad   : > { %v920_v26 = vsel %vm919_vm10, %v2698_v16, %v916_v28  ;;  %v921_v44 = vsel %vm919_vm10, %v916_v28, %v2696_v20  ;;  %v959_v62 = vsel %vm958_vm15, %v2687_v3, %v955_v15  ;;  %v960_v4 = vsel %vm958_vm15, %v955_v15, %v2685_v2  ;;  %v1574_v14 = vld [vmem:[#allocation3 + $0xb8] sm:$0xff]  ;;  %v1573_v60 = vld [vmem:[#allocation3 + $0x168] sm:$0xff] }
 0x1ae   : > { %v1576_v31 = vld [vmem:[#allocation3 + $0x140] sm:$0xff]  ;;  %v1575_v9 = vld [vmem:[#allocation3 + $0x1a8] sm:$0xff]  ;;  %924 = vst [vmem:[#allocation3 + $0x138] sm:$0xf] %v920_v26  ;;  %925 = vst [vmem:[#allocation3 + $0x78] sm:$0xf] %v921_v44 }
 0x1af   : > { %963 = vst [vmem:[#allocation3 + $0x1a0] sm:$0xf] %v959_v62  ;;  %964 = vst [vmem:[#allocation3 + $0x158] sm:$0xf] %v960_v4  ;;  %1604 = vmatprep.subr.mxu1 %v1576_v31 }
 0x1b0   : > { %1605 = vmatpush1.msra.mxu1 %v1575_v9  ;;  %v841_v55 = vpop.permute.xlu1 %840  ;;  %v878_v16 = vpop.permute.xlu0 %877 }
 0x1b1   : > { %1606 = vmatprep.subr.mxu1 %v1574_v14  ;;  %v844_v20 = vsel %vm601_vm9, %v2718_v21, %v841_v55  ;;  %v845_v3 = vsel %vm601_vm9, %v841_v55, %v2716_v19  ;;  %v881_v2 = vsel %vm562_vm8, %v2705_v6, %v878_v16  ;;  %v882_v13 = vsel %vm562_vm8, %v878_v16, %v2703_v23  ;;  %v1568_v30 = vld [vmem:[#allocation3 + $0xe8] sm:$0xff]  ;;  %v1567_v53 = vld [vmem:[#allocation3 + $0x98] sm:$0xff] }
 0x1b2   : > { %1607 = vmatpush1.msra.mxu1 %v1573_v60  ;;  %848 = vst [vmem:[#allocation3 + $0x58] sm:$0xf] %v844_v20  ;;  %849 = vst [vmem:[#allocation3 + $0xd8] sm:$0xf] %v845_v3  ;;  %v1570_v18 = vld [vmem:[#allocation3 + $0xa8] sm:$0xff]  ;;  %v1569_v19 = vld [vmem:[#allocation3 + $0x80] sm:$0xff] }
 0x1b3   : > { %885 = vst [vmem:[#allocation3 + $0x180] sm:$0xf] %v881_v2  ;;  %886 = vst [vmem:[#allocation3 + $0x130] sm:$0xf] %v882_v13  ;;  %1608 = vmatprep.subr.mxu1 %v1572_v29 }
 0x1b4   : > { %1609 = vmatpush1.msra.mxu1 %v1571_v46  ;;  %v767_v21 = vpop.permute.xlu1 %766  ;;  %v804_v22 = vpop.permute.xlu0 %803 }
 0x1b5   : > { %1610 = vmatprep.subr.mxu1 %v1570_v18  ;;  %v770_v6 = vsel %vm679_vm7, %v2729_v48, %v767_v21  ;;  %v771_v23 = vsel %vm679_vm7, %v767_v21, %v2727_v47  ;;  %v807_v25 = vsel %vm640_vm6, %v2725_v27, %v804_v22  ;;  %v808_v54 = vsel %vm640_vm6, %v804_v22, %v2723_v59  ;;  %v1564_v62 = vld [vmem:[#allocation3 + $0x78] sm:$0xff] }
 0x1b6   : > { %1611 = vmatpush1.msra.mxu1 %v1569_v19  ;;  %774 = vst [vmem:[#allocation3 + $0x90] sm:$0xf] %v770_v6  ;;  %775 = vst [vmem:[#allocation3 + $0x118] sm:$0xf] %v771_v23  ;;  %v1566_v28 = vld [vmem:[#allocation3 + $0x158] sm:$0xff]  ;;  %v1565_v47 = vld [vmem:[#allocation3 + $0x1a0] sm:$0xff] }
 0x1b7   : > { %811 = vst [vmem:[#allocation3 + $0x148] sm:$0xf] %v807_v25  ;;  %812 = vst [vmem:[#allocation3 + $0x100] sm:$0xf] %v808_v54  ;;  %1612 = vmatprep.subr.mxu1 %v1568_v30  ;;  %v1563_v4 = vld [vmem:[#allocation3 + $0x138] sm:$0xff] }
 0x1b8   : > { %1613 = vmatpush1.msra.mxu1 %v1567_v53  ;;  %v691_v48 = vpop.permute.xlu1 %690  ;;  %v730_v15 = vpop.permute.xlu0 %729 }
 0x1b9   : > { %1614 = vmatprep.subr.mxu1 %v1566_v28  ;;  %v695_v27 = vsel %vm694_vm5, %v2737_v24, %v691_v48  ;;  %v696_v59 = vsel %vm694_vm5, %v691_v48, %v2735_v17  ;;  %v733_v26 = vsel %vm718_vm4, %v2733_v33, %v730_v15  ;;  %v734_v44 = vsel %vm718_vm4, %v730_v15, %v2731_v32  ;;  %v1560_v16 = vld [vmem:[#allocation3 + $0xd8] sm:$0xff] }
 0x1ba   : > { %1615 = vmatpush1.msra.mxu1 %v1565_v47  ;;  %699 = vst [vmem:[#allocation3 + $0x40] sm:$0xf] %v695_v27  ;;  %700 = vst [vmem:[#allocation3 + $0x178] sm:$0xf] %v696_v59  ;;  %v1562_v31 = vld [vmem:[#allocation3 + $0x130] sm:$0xff]  ;;  %v1561_v17 = vld [vmem:[#allocation3 + $0x180] sm:$0xff] }
 0x1bb   : > { %737 = vst [vmem:[#allocation3 + $0x108] sm:$0xf] %v733_v26  ;;  %738 = vst [vmem:[#allocation3 + $0x110] sm:$0xf] %v734_v44  ;;  %1616 = vmatprep.subr.mxu1 %v1564_v62  ;;  %v1559_v60 = vld [vmem:[#allocation3 + $0x58] sm:$0xff] }
 0x1bc   : > { %1617 = vmatpush1.msra.mxu1 %v1563_v4  ;;  %v613_v24 = vpop.permute.xlu1 %612  ;;  %v652_v9 = vpop.permute.xlu0 %651 }
 0x1bd   : > { %1618 = vmatprep.subr.mxu1 %v1562_v31  ;;  %v617_v33 = vsel %vm616_vm3, %v2745_v7, %v613_v24  ;;  %v618_v32 = vsel %vm616_vm3, %v613_v24, %v2743_v38  ;;  %v656_v14 = vsel %vm655_vm2, %v2741_v10, %v652_v9  ;;  %v657_v55 = vsel %vm655_vm2, %v652_v9, %v2739_v5  ;;  %v1556_v29 = vld [vmem:[#allocation3 + $0x118] sm:$0xff]  ;;  %v1555_v46 = vld [vmem:[#allocation3 + $0x90] sm:$0xff] }
 0x1be   : > { %1619 = vmatpush1.msra.mxu1 %v1561_v17  ;;  %621 = vst [vmem:[#allocation3 + $0x10] sm:$0xf] %v617_v33  ;;  %622 = vst [vmem:[#allocation3 + $0x48] sm:$0xf] %v618_v32  ;;  %v1558_v20 = vld [vmem:[#allocation3 + $0x100] sm:$0xff]  ;;  %v1557_v38 = vld [vmem:[#allocation3 + $0x148] sm:$0xff] }
 0x1bf   : > { %660 = vst [vmem:[#allocation3 + $0x160] sm:$0xf] %v656_v14  ;;  %661 = vst [vmem:[#allocation3 + $0x128] sm:$0xf] %v657_v55  ;;  %1620 = vmatprep.subr.mxu1 %v1560_v16 }
 0x1c0   : > { %1621 = vmatpush1.msra.mxu1 %v1559_v60  ;;  %v1535_v7 = vpop.permute.xlu1 %1534  ;;  %v574_v3 = vpop.permute.xlu0 %573 }
 0x1c1   : > { %1622 = vmatprep.subr.mxu1 %v1558_v20  ;;  %v1538_v10 = vsel %vm562_vm8, %v2751_v12, %v1535_v7  ;;  %v1539_v5 = vsel %vm562_vm8, %v1535_v7, %v2596_v52  ;;  %v578_v2 = vsel %vm577_vm1, %v2749_v45, %v574_v3  ;;  %v579_v13 = vsel %vm577_vm1, %v574_v3, %v2747_v42  ;;  %v1552_v6 = vld [vmem:[#allocation3 + $0x178] sm:$0xff]  ;;  %v1551_v23 = vld [vmem:[#allocation3 + $0x40] sm:$0xff] }
 0x1c2   : > { %1623 = vmatpush1.msra.mxu1 %v1557_v38  ;;  %1542 = vst [vmem:[#allocation3 + $0x120] sm:$0xf] %v1538_v10  ;;  %1543 = vst [vmem:[#allocation3 + $0x188] sm:$0xf] %v1539_v5  ;;  %v1554_v18 = vld [vmem:[#allocation3 + $0x110] sm:$0xff]  ;;  %v1553_v52 = vld [vmem:[#allocation3 + $0x108] sm:$0xff] }
 0x1c3   : > { %582 = vst [vmem:[#allocation3 + $0xb0] sm:$0xf] %v578_v2  ;;  %583 = vst [vmem:[#allocation3 + $0xd0] sm:$0xf] %v579_v13  ;;  %1624 = vmatprep.subr.mxu1 %v1556_v29 }
 0x1c4   : > { %1625 = vmatpush1.msra.mxu1 %v1555_v46  ;;  %v1461_v12 = vpop.permute.xlu1 %1460  ;;  %v1498_v21 = vpop.permute.xlu0 %1497 }
 0x1c5   : > { %1626 = vmatprep.subr.mxu1 %v1554_v18  ;;  %v1464_v45 = vsel %vm640_vm6, %v2755_v0, %v1461_v12  ;;  %v1465_v42 = vsel %vm640_vm6, %v1461_v12, %v2610_v35  ;;  %v1501_v22 = vsel %vm601_vm9, %v2753_v49, %v1498_v21  ;;  %v1502_v19 = vsel %vm601_vm9, %v1498_v21, %v2594_v57  ;;  %v1548_v28 = vld [vmem:[#allocation3 + $0x48] sm:$0xff]  ;;  %v1547_v48 = vld [vmem:[#allocation3 + $0x10] sm:$0xff] }
 0x1c6   : > { %1627 = vmatpush1.msra.mxu1 %v1553_v52  ;;  %1468 = vst [vmem:[#allocation3 + $0x38] sm:$0xf] %v1464_v45  ;;  %1469 = vst [vmem:[#allocation3 + $0x20] sm:$0xf] %v1465_v42  ;;  %v1550_v25 = vld [vmem:[#allocation3 + $0x128] sm:$0xff]  ;;  %v1549_v35 = vld [vmem:[#allocation3 + $0x160] sm:$0xff] }
 0x1c7   : > { %1505 = vst [vmem:[#allocation3 + $0x88] sm:$0xf] %v1501_v22  ;;  %1506 = vst [vmem:[#allocation3 + $0xe0] sm:$0xf] %v1502_v19  ;;  %1628 = vmatprep.subr.mxu1 %v1552_v6  ;;  %vm1695_vm6 = vcmask 31744  }
 0x1c8   : > { %1629 = vmatpush1.msra.mxu1 %v1551_v23  ;;  %v1387_v0 = vpop.permute.xlu1 %1386  ;;  %v1424_v54 = vpop.permute.xlu0 %1423 }
 0x1c9   : > { %1630 = vmatprep.subr.mxu1 %v1550_v25  ;;  %v1390_v49 = vsel %vm718_vm4, %v2759_v50, %v1387_v0  ;;  %v1391_v57 = vsel %vm718_vm4, %v1387_v0, %v2622_v37  ;;  %v1427_v30 = vsel %vm679_vm7, %v2757_v11, %v1424_v54  ;;  %v1428_v53 = vsel %vm679_vm7, %v1424_v54, %v2608_v34  ;;  %v1598_v26 = vld [vmem:[#allocation3 + $0x188] sm:$0xff]  ;;  %v1597_v44 = vld [vmem:[#allocation3 + $0x120] sm:$0xff]  ;;  %v1693_v54 = vld [vmem:[%s2900_s7] sm:$0xff] }
 0x1ca   : > { %1631 = vmatpush1.msra.mxu1 %v1549_v35  ;;  %1394 = vst [vmem:[#allocation3 + $0x8] sm:$0xf] %v1390_v49  ;;  %1395 = vst [vmem:[#allocation3 + $0x60] sm:$0xf] %v1391_v57  ;;  %v1546_v15 = vld [vmem:[#allocation3 + $0xd0] sm:$0xff] }
 0x1cb   : > { %1431 = vst [vmem:[#allocation3 + $0x70] sm:$0xf] %v1427_v30  ;;  %1432 = vst [vmem:[#allocation3 + $0x68] sm:$0xf] %v1428_v53  ;;  %1632 = vmatprep.subr.mxu1 %v1548_v28  ;;  %v1545_v37 = vld [vmem:[#allocation3 + $0xb0] sm:$0xff] }
 0x1cc   : > { %1633 = vmatpush1.msra.mxu1 %v1547_v48  ;;  %v1313_v50 = vpop.permute.xlu1 %1312  ;;  %v1350_v47 = vpop.permute.xlu0 %1349 }
 0x1cd   : > { %1634 = vmatprep.subr.mxu1 %v1546_v15  ;;  %v1316_v11 = vsel %vm655_vm2, %v2763_v51, %v1313_v50  ;;  %v1317_v34 = vsel %vm655_vm2, %v1313_v50, %v2630_v41  ;;  %v1353_v27 = vsel %vm694_vm5, %v2761_v8, %v1350_v47  ;;  %v1354_v59 = vsel %vm694_vm5, %v1350_v47, %v2620_v36  ;;  %v1594_v9 = vld [vmem:[#allocation3 + $0x20] sm:$0xff]  ;;  %v1593_v17 = vld [vmem:[#allocation3 + $0x38] sm:$0xff]  ;;  %v1960_v47 = vld [vmem:[%s2154_s14] sm:$0xff] }
 0x1ce   : > { %1635 = vmatpush1.msra.mxu1 %v1545_v37  ;;  %1320 = vst [vmem:[#allocation3 + $0x150] sm:$0xf] %v1316_v11  ;;  %1321 = vst [vmem:[#allocation3 + $0x30] sm:$0xf] %v1317_v34  ;;  %v1596_v62 = vld [vmem:[#allocation3 + $0xe0] sm:$0xff]  ;;  %v1595_v41 = vld [vmem:[#allocation3 + $0x88] sm:$0xff] }
 0x1cf   : > { %1357 = vst [vmem:[#allocation3 + $0xf8] sm:$0xf] %v1353_v27  ;;  %1358 = vst [vmem:[#allocation3 + $0x18] sm:$0xf] %v1354_v59  ;;  %1646 = vmatprep.subr.mxu1 %v1598_v26  ;;  %vm1702_vm5 = vcmask 1043456   ;;  %v1961_v26 = vld [vmem:[%s2154_s14 + $0x8] sm:$0xff] }
 0x1d0   : > { %1647 = vmatpush2.msra.mxu1 %v1597_v44  ;;  %v1239_v51 = vpop.permute.xlu1 %1238  ;;  %v1276_v4 = vpop.permute.xlu0 %1275 }
 0x1d1   : > { %1648 = vmatprep.subr.mxu1 %v1596_v62  ;;  %v1242_v8 = vsel %vm577_vm1, %v2767_v43, %v1239_v51  ;;  %v1243_v36 = vsel %vm577_vm1, %v1239_v51, %v2640_v61  ;;  %v1279_v31 = vsel %vm616_vm3, %v2765_v63, %v1276_v4  ;;  %v1280_v24 = vsel %vm616_vm3, %v1276_v4, %v2628_v39  ;;  %v1590_v14 = vld [vmem:[#allocation3 + $0x60] sm:$0xff]  ;;  %v1589_v55 = vld [vmem:[#allocation3 + $0x8] sm:$0xff] }
 0x1d2   : > { %1649 = vmatpush2.msra.mxu1 %v1595_v41  ;;  %1246 = vst [vmem:[#allocation3 + $0xc0] sm:$0xf] %v1242_v8  ;;  %1247 = vst [vmem:[#allocation3 + $0x190] sm:$0xf] %v1243_v36  ;;  %v1592_v33 = vld [vmem:[#allocation3 + $0x68] sm:$0xff]  ;;  %v1591_v61 = vld [vmem:[#allocation3 + $0x70] sm:$0xff] }
 0x1d3   : > { %1283 = vst [vmem:[#allocation3 + $0xc8] sm:$0xf] %v1279_v31  ;;  %1284 = vst [vmem:[#allocation3 + $0xf0] sm:$0xf] %v1280_v24  ;;  %1650 = vmatprep.subr.mxu1 %v1594_v9  ;;  %vm2918_vm1 = vcmask 973824   ;;  %vm2920_vm3 = vcmask 982016  }
 0x1d4   : > { %1651 = vmatpush2.msra.mxu1 %v1593_v17  ;;  %v1165_v43 = vpop.permute.xlu1 %1164  ;;  %v1202_v32 = vpop.permute.xlu0 %1201  ;;  %vm2919_vm2 = vmmov %vm2918_vm1  ;;  %v1962_v41 = vld [vmem:[%s2154_s14 + $0x10] sm:$0xff]  ;;  %v1963_v24 = vld [vmem:[%s2154_s14 + $0x18] sm:$0xff] }
 0x1d5   : > { %1652 = vmatprep.subr.mxu1 %v1592_v33  ;;  %v1205_v63 = vsel %vm2918_vm1, %v2769_v58, %v1202_v32  ;;  %v1206_v39 = vsel %vm2919_vm2, %v1202_v32, %v2638_v56  ;;  %vm2921_vm4 = vmmov %vm2920_vm3  ;;  %v1586_v58 = vld [vmem:[#allocation3 + $0x30] sm:$0xff] }
 0x1d6   : > { %1653 = vmatpush2.msra.mxu1 %v1591_v61  ;;  %1209 = vst [vmem:[#allocation3 + $0x170] sm:$0xf] %v1205_v63  ;;  %1210 = vst [vmem:[#allocation3 + $0x198] sm:$0xf] %v1206_v39  ;;  %v1588_v16 = vld [vmem:[#allocation3 + $0x18] sm:$0xff]  ;;  %v1585_v56 = vld [vmem:[#allocation3 + $0x150] sm:$0xff] }
 0x1d7   : > { %1654 = vmatprep.subr.mxu1 %v1590_v14  ;;  %v1587_v7 = vld [vmem:[#allocation3 + $0xf8] sm:$0xff] }
 0x1d8   : > { %1655 = vmatpush2.msra.mxu1 %v1589_v55  ;;  %v1163_v60 = vpop.permute.xlu1 %1162  ;;  %v1167_v20 = vpop.permute.xlu0 %1166 }
 0x1d9   : > { %1656 = vmatprep.subr.mxu1 %v1588_v16  ;;  %v1168_v3 = vsel %vm2920_vm3, %v1163_v60, %v1165_v43  ;;  %v1169_v38 = vsel %vm2921_vm4, %v1165_v43, %v1167_v20  ;;  %v1582_v2 = vld [vmem:[#allocation3 + $0x190] sm:$0xff]  ;;  %v1581_v13 = vld [vmem:[#allocation3 + $0xc0] sm:$0xff] }
 0x1da   : > { %1657 = vmatpush2.msra.mxu1 %v1587_v7  ;;  %1172 = vst [vmem:[#allocation3 + $0x50] sm:$0xf] %v1168_v3  ;;  %1173 = vst [vmem:[#allocation3 + $0xa0] sm:$0xf] %v1169_v38  ;;  %v1584_v10 = vld [vmem:[#allocation3 + $0xf0] sm:$0xff]  ;;  %v1583_v5 = vld [vmem:[#allocation3 + $0xc8] sm:$0xff] }
 0x1db   : > { %1658 = vmatprep.subr.mxu1 %v1586_v58 }
 0x1dc   : > { %1659 = vmatpush2.msra.mxu1 %v1585_v56 }
 0x1dd   : > { %1660 = vmatprep.subr.mxu1 %v1584_v10  ;;  %v1580_v29 = vld [vmem:[#allocation3 + $0x198] sm:$0xff]  ;;  %v1579_v46 = vld [vmem:[#allocation3 + $0x170] sm:$0xff] }
 0x1de   : > { %1661 = vmatpush2.msra.mxu1 %v1583_v5 }
 0x1df   : > { %1662 = vmatprep.subr.mxu1 %v1582_v2 }
 0x1e0   : > { %1663 = vmatpush2.msra.mxu1 %v1581_v13 }
 0x1e1   : > { %1664 = vmatprep.subr.mxu1 %v1580_v29  ;;  %v1578_v18 = vld [vmem:[#allocation3 + $0xa0] sm:$0xff]  ;;  %v1577_v12 = vld [vmem:[#allocation3 + $0x50] sm:$0xff] }
 0x1e2   : > { %1665 = vmatpush2.msra.mxu1 %v1579_v46 }
 0x1e3   : > { %1666 = vmatprep.subr.mxu1 %v1578_v18 }
 0x1e4   : > { %1667 = vmatpush2.msra.mxu1 %v1577_v12 }
 0x1e5   : > { %1669 = vmatmul.mubr.f32.vlgmr.msra.gmra.mxu1 %v2683_v40  ;;  %v1679_v21 = vpop.permute.xlu0 %1678  ;;  %v1687_v22 = vpop.permute.xlu1 %1686  ;;  %v1694_v40 = vld [vmem:[%s2900_s7 + $0x8] sm:$0xff] }
 0x1e9   : > { %v1791_v35 = vpop.permute.xlu0 %1790  ;;  %v1796_v49 = vpop.permute.xlu1 %1795 }
 0x1ed   : > { %v1807_v53 = vpop.permute.xlu0 %1806  ;;  %v1812_v34 = vpop.permute.xlu1 %1811 }
 0x2a5   : > { %v1670_v52 = vpop.f32.mrf.mxu1 }
 0x2a6   : > { %v1681_v45 = vmul.f32 %v1679_v21, %v1670_v52 }
 0x2a7   : > { %v1672_v42 = vpop.f32.mrf.mxu1 }
 0x2a8   : > { %v1682_v19 = vmul.f32 %v1679_v21, %v1672_v42  ;;  %v1689_v6 = vadd.f32 %v1687_v22, %v1681_v45 }
 0x2aa   : > { %v1690_v23 = vadd.f32 %v1687_v22, %v1682_v19  ;;  %v1691_v0 = vmax.f32 %v1689_v6, 0.0 }
 0x2ac   : > { %v1692_v25 = vmax.f32 %v1690_v23, 0.0 }
 0x2ae   : > { %1922 = vmatprep.subr.msk.mxu0 %vm1702_vm5, %v1692_v25 }
 0x2af   : > { %1923 = vmatpush1.msk.msra.mxu0 %vm1702_vm5, %v1691_v0 }
 0x2b0   : > { %1924 = vmatmul.mubr.msk.f32.vlgmr.msra.gmra.mxu0 %vm1695_vm6, %v1693_v54 }
 0x2b1   : > { %1779 = vmatprep.mubr.f32.mxu0 %v1972_v1 }
 0x2b4   : > { %1925 = vmatmul.mubr.msk.f32.gmra.mxu0 %vm1695_vm6, %v1694_v40 }
 0x370   : > { %v1775_v57 = vpop.f32.mrf.mxu0 }
 0x371   : > { %v1798_v30 = vmul.f32 %v1791_v35, %v1775_v57 }
 0x372   : > { %v1777_v28 = vpop.f32.mrf.mxu0 }
 0x373   : > { %v1814_v48 = vadd.f32 %v1807_v53, %v1798_v30  ;;  %v1799_v15 = vmul.f32 %v1791_v35, %v1777_v28 }
 0x374   : > { %v1781_v50 = vpop.f32.mrf.mxu0 }
 0x375   : > { %v1818_v37 = vadd.f32 %v1960_v47, %v1814_v48  ;;  %v1815_v1 = vadd.f32 %v1807_v53, %v1799_v15  ;;  %v1800_v11 = vmul.f32 %v1796_v49, %v1781_v50 }
 0x376   : > { %v1783_v27 = vpop.f32.mrf.mxu0 }
 0x377   : > { %v1822_v59 = vmax.f32 %v1818_v37, 0.0  ;;  %v1819_v44 = vadd.f32 %v1961_v26, %v1815_v1  ;;  %v1816_v62 = vadd.f32 %v1812_v34, %v1800_v11  ;;  %v1801_v51 = vmul.f32 %v1796_v49, %v1783_v27 }
 0x379   : > { %1826 = vst [vmem:[%s386_s23] sm:$0xff] %v1822_v59  ;;  %v1823_v4 = vmax.f32 %v1819_v44, 0.0  ;;  %v1820_v8 = vadd.f32 %v1962_v41, %v1816_v62  ;;  %v1817_v36 = vadd.f32 %v1812_v34, %v1801_v51 }
 0x37b   : > { %1827 = vst [vmem:[%s386_s23 + $0x8] sm:$0xff] %v1823_v4  ;;  %v1824_v31 = vmax.f32 %v1820_v8, 0.0  ;;  %v1821_v9 = vadd.f32 %v1963_v24, %v1817_v36 }
 0x37d   : > { %1828 = vst [vmem:[%s386_s23 + $0x10] sm:$0xff] %v1824_v31  ;;  %v1825_v17 = vmax.f32 %v1821_v9, 0.0 }
 0x37f   : > { %1829 = vst [vmem:[%s386_s23 + $0x18] sm:$0xff] %v1825_v17 }
 0x380 PF: > { %s21_s17 = sadd.s32 1, %s1970_s17  }
 0x381   : > { %p18_p4 = scmp.ge.s32.totalorder %s21_s17, 4  }
 0x383   :  { %20 = sbr.rel (!%p18_p4) target bundleno = 1 (0x1), region = 120 }

</bundles_post_ra>
